<compile_context>
chip_gen: v7x
topology: tpu7x:2x2x1
jax: 0.10.0
libtpu: 0.0.40
codegen_flags: <defaults>
</compile_context>

<pallas_src>
import functools

import jax
import jax.numpy as jnp
from jax.experimental import pallas as pl
from jax.experimental.pallas import tpu as pltpu

LEAKY_SLOPE = 0.01   # nn.LeakyReLU default
BN_EPS = 1e-5        # nn.BatchNorm1d default


def _round_up(n, m):
    return ((n + m - 1) // m) * m


def _pad2d(a, rows, cols, dtype):
    a = jnp.asarray(a)
    out = jnp.pad(a, ((0, rows - a.shape[0]), (0, cols - a.shape[1])))
    return out.astype(dtype)


def _vmem_capacity_bytes():
    """Per-generation physical VMEM (v5e/v6e: 128 MiB; v7x: 64 MiB per core)."""
    try:
        info = pltpu.get_tpu_info()
        for name in ("vmem_capacity_bytes", "vmem_size_bytes", "vmem_bytes"):
            v = getattr(info, name, None)
            if v:
                return int(v)
    except Exception:
        pass
    return 64 << 20   # conservative fallback (v7x per-core)


def _linear_kernel(x_ref, w_ref, b_ref, o_ref, acc_ref):
    """Flatten -> single output Linear (num_hidden_layers == 0): K-tiled matmul."""
    @pl.when(pl.program_id(1) == 0)
    def _zero():
        acc_ref[...] = jnp.zeros_like(acc_ref)

    acc_ref[...] += jnp.dot(x_ref[...], w_ref[...],
                            preferred_element_type=jnp.float32)

    @pl.when(pl.program_id(1) == pl.num_programs(1) - 1)
    def _store():
        o_ref[...] = (acc_ref[...] + b_ref[...]).astype(o_ref.dtype)


def _mlp_kernel(num_hidden_layers, has_output_layer, true_batch, tm, *refs):
    """Fused MLP forward (num_hidden_layers > 0).

    refs layout:
      x_ref  : streamed [tm, tk] bf16 batch/K tile
      w0_ref : K-tiled [tk, N0_pad] bf16 layer-0 weight
      gamma0, beta0,
      [w_l, gamma_l, beta_l] * (num_hidden_layers - 1),
      [w_out, b_out] if has_output_layer            (resident, lane-padded)
      out_ref : [B_pad, N_out_pad] f32 (resident, written at the last grid step)
      h_scr   : [B_pad, N0_pad] f32 layer-0 activation
      sum_scr, sq_scr : [1, N0_pad] f32 layer-0 BN partial statistics
    """
    x_ref, w0_ref = refs[0], refs[1]
    out_ref, h_scr, sum_scr, sq_scr = refs[-4], refs[-3], refs[-2], refs[-1]
    param_refs = refs[2:-4]

    i = pl.program_id(0)
    k = pl.program_id(1)
    nb = pl.num_programs(0)
    nk = pl.num_programs(1)

    # ---- init the layer-0 BN stat accumulators at the very first grid step ----
    @pl.when((i == 0) & (k == 0))
    def _init_stats():
        sum_scr[...] = jnp.zeros_like(sum_scr)
        sq_scr[...] = jnp.zeros_like(sq_scr)

    # ---- phase 1: batch/K-tiled layer-0 matmul (bf16 operands, f32 accumulate).
    # Hidden-layer Linear bias is omitted: it cancels exactly under the following
    # training-mode BatchNorm, and keeps padded batch rows exactly zero so the
    # partial statistics below need no row mask.
    ht = jnp.dot(x_ref[...], w0_ref[...], preferred_element_type=jnp.float32)
    rows = pl.ds(pl.multiple_of(i * tm, tm), tm)

    @pl.when(k == 0)
    def _store_first():
        h_scr[rows, :] = ht

    @pl.when(k > 0)
    def _accumulate():
        h_scr[rows, :] = h_scr[rows, :] + ht

    # Per-feature sum / sum-of-squares accumulated under phase 1 (hidden behind
    # MXU/DMA work instead of the serialized epilogue).
    @pl.when(k == nk - 1)
    def _partial_stats():
        hf = h_scr[rows, :]
        sum_scr[...] = sum_scr[...] + jnp.sum(hf, axis=0, keepdims=True)
        sq_scr[...] = sq_scr[...] + jnp.sum(hf * hf, axis=0, keepdims=True)

    # ---- phase 2 (last grid step only): BN finalize + remaining small layers ----
    @pl.when((i == nb - 1) & (k == nk - 1))
    def _finalize():
        b_pad = h_scr.shape[0]
        inv_n = jnp.float32(1.0 / true_batch)
        row_ids = jax.lax.broadcasted_iota(jnp.int32, (b_pad, 1), 0)
        valid = row_ids < true_batch

        # Layer-0 BN from the phase-1 accumulators (padded rows are exactly zero;
        # dividing by the true batch matches training-mode BatchNorm1d).
        gamma0 = param_refs[0][...]
        beta0 = param_refs[1][...]
        mean = sum_scr[...] * inv_n
        var = jnp.maximum(sq_scr[...] * inv_n - mean * mean, 0.0)
        scale = gamma0 * jax.lax.rsqrt(var + BN_EPS)
        shift = beta0 - mean * scale
        h = h_scr[...] * scale + shift
        h = jnp.where(h >= 0, h, LEAKY_SLOPE * h)

        idx = 2
        for _ in range(num_hidden_layers - 1):
            w = param_refs[idx][...]
            gamma = param_refs[idx + 1][...]
            beta = param_refs[idx + 2][...]
            idx += 3
            h = jnp.dot(h.astype(w.dtype), w, preferred_element_type=jnp.float32)
            # Two-pass BN over the true batch rows (padded rows masked from stats).
            hv = jnp.where(valid, h, 0.0)
            mean = jnp.sum(hv, axis=0, keepdims=True) * inv_n
            cent = jnp.where(valid, h - mean, 0.0)
            var = jnp.sum(cent * cent, axis=0, keepdims=True) * inv_n
            scale = gamma * jax.lax.rsqrt(var + BN_EPS)
            shift = beta - mean * scale
            h = h * scale + shift
            h = jnp.where(h >= 0, h, LEAKY_SLOPE * h)

        if has_output_layer:
            w = param_refs[idx][...]
            b = param_refs[idx + 1][...]
            h = jnp.dot(h.astype(w.dtype), w,
                        preferred_element_type=jnp.float32) + b

        # TODO(synk): Dropout omitted (module default dropout=0.0 adds no layer).
        out_ref[...] = h.astype(out_ref.dtype)


def init_mlp_params(key, in_features, intermediate_size, out_features,
                    num_hidden_layers, bias=True):
    """Deterministic parameter init (shapes match the PyTorch module;
    Linear weights stored transposed as [in, out])."""
    params = []
    fan_in = in_features
    for _ in range(num_hidden_layers):
        key, kw, kb = jax.random.split(key, 3)
        scale = 1.0 / jnp.sqrt(jnp.float32(fan_in))
        w = jax.random.uniform(kw, (fan_in, intermediate_size), jnp.float32,
                               -scale, scale)
        b = (jax.random.uniform(kb, (1, intermediate_size), jnp.float32,
                                -scale, scale)
             if bias else jnp.zeros((1, intermediate_size), jnp.float32))
        gamma = jnp.ones((1, intermediate_size), jnp.float32)   # BN weight init
        beta = jnp.zeros((1, intermediate_size), jnp.float32)   # BN bias init
        params += [w, b, gamma, beta]
        fan_in = intermediate_size

    if out_features > 0:
        key, kw, kb = jax.random.split(key, 3)
        scale = 1.0 / jnp.sqrt(jnp.float32(fan_in))
        w = jax.random.uniform(kw, (fan_in, out_features), jnp.float32,
                               -scale, scale)
        b = (jax.random.uniform(kb, (1, out_features), jnp.float32, -scale, scale)
             if bias else jnp.zeros((1, out_features), jnp.float32))
        params += [w, b]

    return params


def mlp_forward(x, params, num_hidden_layers, out_features,
                matmul_dtype=jnp.bfloat16, max_batch_tile=512, max_k_tile=2048):
    """x: [B, ...] -> nn.Flatten to [B, F] -> fused MLP kernel -> [B, out]."""
    batch = x.shape[0]
    x2d = x.reshape(batch, -1)
    in_features = x2d.shape[1]
    has_output_layer = out_features > 0

    if num_hidden_layers == 0 and not has_output_layer:
        return x2d   # module degenerates to nn.Flatten

    # Batch tiling: sublane-pad to 8 rows, large tile amortizes per-step overhead.
    b8 = _round_up(batch, 8)
    tm = min(b8, max_batch_tile)
    b_pad = _round_up(b8, tm)

    # K tiling of the dominant first matmul; features padded to a K-tile multiple.
    f128 = _round_up(in_features, 128)
    tk = min(f128, max_k_tile)
    f_pad = _round_up(f128, tk)

    # Pre-cast the activation stream to bf16 (half the x DMA bytes / tile VMEM).
    x_padded = _pad2d(x2d, b_pad, f_pad, matmul_dtype)
    grid = (b_pad // tm, f_pad // tk)
    cap = _vmem_capacity_bytes()

    # ---- degenerate path: Flatten -> single output Linear (batch-parallel) ----
    if num_hidden_layers == 0:
        w, b = params[0], params[1]
        n_true = w.shape[1]
        n_pad = _round_up(n_true, 128)
        w_p = _pad2d(w, f_pad, n_pad, matmul_dtype)
        b_p = _pad2d(b, 1, n_pad, jnp.float32)
        out = pl.pallas_call(
            _linear_kernel,
            out_shape=jax.ShapeDtypeStruct((b_pad, n_pad), jnp.float32),
            grid=grid,
            in_specs=[pl.BlockSpec((tm, tk), lambda i, k: (i, k)),
                      pl.BlockSpec((tk, n_pad), lambda i, k: (k, 0)),
                      pl.BlockSpec((1, n_pad), lambda i, k: (0, 0))],
            out_specs=pl.BlockSpec((tm, n_pad), lambda i, k: (i, 0)),
            scratch_shapes=[pltpu.VMEM((tm, n_pad), jnp.float32)],
            compiler_params=pltpu.CompilerParams(
                dimension_semantics=("parallel", "arbitrary"),
                vmem_limit_bytes=int(min(64 << 20, cap - (8 << 20)))),
        )(x_padded, w_p, b_p)
        return out[:batch, :n_true]

    # ---- fused path: build kernel params (weights bf16; BN affine / out bias f32).
    # Hidden-layer Linear biases are dropped: BatchNorm's mean subtraction cancels
    # them exactly (training mode), saving VPU adds and HBM/VMEM bytes.
    kparams = []
    flops = 0
    k_true, k_pad = in_features, f_pad
    idx = 0
    for _ in range(num_hidden_layers):
        w, b, gamma, beta = params[idx:idx + 4]   # b intentionally unused (cancels in BN)
        idx += 4
        n_true = w.shape[1]
        n_pad = _round_up(n_true, 128)
        kparams += [
            _pad2d(w, k_pad, n_pad, matmul_dtype),
            _pad2d(gamma, 1, n_pad, jnp.float32),
            _pad2d(beta, 1, n_pad, jnp.float32),
        ]
        flops += 2 * batch * k_true * n_true
        k_true, k_pad = n_true, n_pad
    if has_output_layer:
        w, b = params[idx:idx + 2]
        n_true = w.shape[1]
        n_pad = _round_up(n_true, 128)
        kparams += [_pad2d(w, k_pad, n_pad, matmul_dtype),
                    _pad2d(b, 1, n_pad, jnp.float32)]
        flops += 2 * batch * k_true * n_true
        final_true, final_pad = n_true, n_pad
    else:
        final_true, final_pad = k_true, k_pad

    n0_pad = kparams[0].shape[1]   # padded width of the layer-0 output

    # VMEM budget (generation-aware, with headroom below the physical capacity).
    # TODO(synk): for very large B_pad on v7x, h_scr could be stored in bf16 or
    # spilled to HBM, and phase 1 split into a batch-'parallel' call for 2 TCs.
    itemsize = jnp.dtype(matmul_dtype).itemsize
    resident_param_bytes = sum(int(p.size) * p.dtype.itemsize for p in kparams[1:])
    max_width = max([p.shape[1] for p in kparams] + [final_pad])
    vmem_est = (2 * tm * tk * itemsize            # double-buffered x tile
                + 2 * tk * n0_pad * itemsize      # double-buffered w0 tile
                + resident_param_bytes            # single-buffered resident params
                + b_pad * final_pad * 4           # resident output block
                + b_pad * n0_pad * 4              # h_scr
                + 2 * 8 * 128 * 4                 # BN stat accumulators
                + 3 * b_pad * max_width * 4)      # phase-2 temporaries headroom
    vmem_limit = int(min(max(vmem_est + (16 << 20), 32 << 20), cap - (8 << 20)))

    bytes_accessed = (int(x_padded.size) * x_padded.dtype.itemsize
                      + sum(int(p.size) * p.dtype.itemsize for p in kparams)
                      + b_pad * final_pad * 4)

    kernel = functools.partial(_mlp_kernel, num_hidden_layers, has_output_layer,
                               batch, tm)
    scratch = [pltpu.VMEM((b_pad, n0_pad), jnp.float32),   # layer-0 activation
               pltpu.VMEM((1, n0_pad), jnp.float32),       # BN sum accumulator
               pltpu.VMEM((1, n0_pad), jnp.float32)]       # BN sum-of-squares

    def _make_specs(single_buffer):
        # Constant-index blocks are resident; single-buffer them to halve VMEM.
        const_kw = {"pipeline_mode": pl.Buffered(1)} if single_buffer else {}
        in_specs = [pl.BlockSpec((tm, tk), lambda i, k: (i, k)),       # streamed x
                    pl.BlockSpec((tk, n0_pad), lambda i, k: (k, 0))]   # K-tiled w0
        in_specs += [pl.BlockSpec(p.shape, lambda i, k: (0, 0), **const_kw)
                     for p in kparams[1:]]                             # resident params
        out_spec = pl.BlockSpec((b_pad, final_pad), lambda i, k: (0, 0), **const_kw)
        return in_specs, out_spec

    def _call(single_buffer):
        in_specs, out_spec = _make_specs(single_buffer)
        return pl.pallas_call(
            kernel,
            out_shape=jax.ShapeDtypeStruct((b_pad, final_pad), jnp.float32),
            grid=grid,
            in_specs=in_specs,
            out_specs=out_spec,
            scratch_shapes=scratch,
            compiler_params=pltpu.CompilerParams(
                dimension_semantics=("arbitrary", "arbitrary"),
                vmem_limit_bytes=vmem_limit),
            cost_estimate=pl.CostEstimate(flops=flops,
                                          transcendentals=num_hidden_layers * n0_pad,
                                          bytes_accessed=bytes_accessed),
        )(x_padded, *kparams)

    try:
        out_padded = _call(True)     # single-buffer constant-index blocks
    except Exception:
        out_padded = _call(False)    # fall back to default double-buffering

    return out_padded[:batch, :final_true]


def mlp_reference(x, params, num_hidden_layers, out_features,
                  matmul_dtype=jnp.bfloat16):
    """Pure-JAX reference mirroring the PyTorch forward (training-mode BN).
    Matmul operands mirror the kernel's bf16 MXU path; BN / activation in f32."""
    h = x.reshape(x.shape[0], -1).astype(jnp.float32)
    idx = 0
    for _ in range(num_hidden_layers):
        w, b, gamma, beta = params[idx:idx + 4]
        idx += 4
        h = jnp.dot(h.astype(matmul_dtype), w.astype(matmul_dtype),
                    preferred_element_type=jnp.float32) + b
        mean = jnp.mean(h, axis=0, keepdims=True)
        var = jnp.mean((h - mean) ** 2, axis=0, keepdims=True)
        h = (h - mean) / jnp.sqrt(var + BN_EPS) * gamma + beta
        h = jnp.where(h >= 0, h, LEAKY_SLOPE * h)
    if out_features > 0:
        w, b = params[idx], params[idx + 1]
        h = jnp.dot(h.astype(matmul_dtype), w.astype(matmul_dtype),
                    preferred_element_type=jnp.float32) + b
    return h


if __name__ == "__main__":
    # Small shapes consistent with the module's forward (Flatten over NCHW input).
    B, C, H, W = 2, 4, 16, 16
    in_features = C * H * W          # 1024 after Flatten
    intermediate_size = 32
    out_features = 8
    num_hidden_layers = 2

    key = jax.random.PRNGKey(0)
    kx, kp = jax.random.split(key)
    x = jax.random.normal(kx, (B, C, H, W), jnp.float32)

    params = init_mlp_params(kp, in_features, intermediate_size, out_features,
                             num_hidden_layers, bias=True)

    out = mlp_forward(x, params, num_hidden_layers, out_features)
    out = jax.block_until_ready(out)

    ref = mlp_reference(x, params, num_hidden_layers, out_features)
    assert out.shape == (B, out_features), out.shape
    # Matmuls use bf16 operands (mirrored in the reference); BN/activation in f32.
    assert jnp.allclose(out, ref, atol=2e-3, rtol=2e-3), "mismatch vs reference"

    print("KERNEL_OK")
</pallas_src>

<mosaic_0001>
module attributes {stable_mosaic.version = 11 : i64} {
  func.func @_mlp_kernel(%arg0: i32, %arg1: i32, %arg2: memref<8x1024xbf16, #tpu.memory_space<vmem>>, %arg3: memref<1024x128xbf16, #tpu.memory_space<vmem>>, %arg4: memref<1x128xf32, #tpu.memory_space<vmem>>, %arg5: memref<1x128xf32, #tpu.memory_space<vmem>>, %arg6: memref<128x128xbf16, #tpu.memory_space<vmem>>, %arg7: memref<1x128xf32, #tpu.memory_space<vmem>>, %arg8: memref<1x128xf32, #tpu.memory_space<vmem>>, %arg9: memref<128x128xbf16, #tpu.memory_space<vmem>>, %arg10: memref<1x128xf32, #tpu.memory_space<vmem>>, %arg11: memref<8x128xf32, #tpu.memory_space<vmem>>, %arg12: memref<8x128xf32, #tpu.memory_space<vmem>>, %arg13: memref<1x128xf32, #tpu.memory_space<vmem>>, %arg14: memref<1x128xf32, #tpu.memory_space<vmem>>) attributes {dimension_semantics = [#tpu.dimension_semantics<arbitrary>, #tpu.dimension_semantics<arbitrary>], iteration_bounds = array<i64: 1, 1>, scalar_prefetch = 0 : i64, scratch_operands = 3 : i64, tpu.core_type = #tpu.core_type<tc>, window_params = [{transform_indices = @transform_0, window_bounds = array<i64: 8, 1024>}, {transform_indices = @transform_1, window_bounds = array<i64: 1024, 128>}, {pipeline_mode = #tpu.pipeline_mode<synchronous>, transform_indices = @transform_2, window_bounds = array<i64: 1, 128>}, {pipeline_mode = #tpu.pipeline_mode<synchronous>, transform_indices = @transform_3, window_bounds = array<i64: 1, 128>}, {pipeline_mode = #tpu.pipeline_mode<synchronous>, transform_indices = @transform_4, window_bounds = array<i64: 128, 128>}, {pipeline_mode = #tpu.pipeline_mode<synchronous>, transform_indices = @transform_5, window_bounds = array<i64: 1, 128>}, {pipeline_mode = #tpu.pipeline_mode<synchronous>, transform_indices = @transform_6, window_bounds = array<i64: 1, 128>}, {pipeline_mode = #tpu.pipeline_mode<synchronous>, transform_indices = @transform_7, window_bounds = array<i64: 128, 128>}, {pipeline_mode = #tpu.pipeline_mode<synchronous>, transform_indices = @transform_8, window_bounds = array<i64: 1, 128>}, {pipeline_mode = #tpu.pipeline_mode<synchronous>, transform_indices = @transform_9, window_bounds = array<i64: 8, 128>}]} {
    %c0_i32 = arith.constant 0 : i32
    %0 = arith.cmpi eq, %arg0, %c0_i32 : i32
    %c0_i32_0 = arith.constant 0 : i32
    %1 = arith.cmpi eq, %arg1, %c0_i32_0 : i32
    %2 = arith.andi %0, %1 : i1
    %3 = arith.extui %2 : i1 to i32
    %c0_i32_1 = arith.constant 0 : i32
    %4 = arith.cmpi ne, %3, %c0_i32_1 : i32
    scf.if %4 {
      %cst_14 = arith.constant 0.000000e+00 : f32
      %24 = vector.broadcast %cst_14 : f32 to vector<1x128xf32>
      %c0_15 = arith.constant 0 : index
      %c0_16 = arith.constant 0 : index
      %25 = vector.load %arg13[%c0_15, %c0_16] : memref<1x128xf32, #tpu.memory_space<vmem>>, vector<1x128xf32>
      tpu.vector_store %arg13[%c0_15, %c0_16], %24 {strides = array<i32>} : memref<1x128xf32, #tpu.memory_space<vmem>>, vector<1x128xf32>,
      %cst_17 = arith.constant 0.000000e+00 : f32
      %26 = vector.broadcast %cst_17 : f32 to vector<1x128xf32>
      %c0_18 = arith.constant 0 : index
      %c0_19 = arith.constant 0 : index
      %27 = vector.load %arg14[%c0_18, %c0_19] : memref<1x128xf32, #tpu.memory_space<vmem>>, vector<1x128xf32>
      tpu.vector_store %arg14[%c0_18, %c0_19], %26 {strides = array<i32>} : memref<1x128xf32, #tpu.memory_space<vmem>>, vector<1x128xf32>,
    } else {
    }
    %c0 = arith.constant 0 : index
    %c0_2 = arith.constant 0 : index
    %5 = vector.load %arg2[%c0, %c0_2] : memref<8x1024xbf16, #tpu.memory_space<vmem>>, vector<8x1024xbf16>
    %c0_3 = arith.constant 0 : index
    %c0_4 = arith.constant 0 : index
    %6 = vector.load %arg3[%c0_3, %c0_4] : memref<1024x128xbf16, #tpu.memory_space<vmem>>, vector<1024x128xbf16>
    %cst = arith.constant dense<0.000000e+00> : vector<8x128xf32>
    %7 = tpu.matmul %5, %6, %cst {dimension_numbers = #tpu.dot_dimension_numbers<[1], [0], [0], [1], [0, 0, 1, 1], [], []>} : vector<8x1024xbf16>, vector<1024x128xbf16>, vector<8x128xf32> -> vector<8x128xf32>
    %c8_i32 = arith.constant 8 : i32
    %8 = arith.muli %arg0, %c8_i32 : i32
    %9 = tpu.assume_multiple %8, 8 : i32
    %c0_i32_5 = arith.constant 0 : i32
    %10 = arith.cmpi eq, %arg1, %c0_i32_5 : i32
    %11 = arith.extui %10 : i1 to i32
    %c0_i32_6 = arith.constant 0 : i32
    %12 = arith.cmpi ne, %11, %c0_i32_6 : i32
    scf.if %12 {
      %24 = arith.index_cast %9 : i32 to index
      %c0_14 = arith.constant 0 : index
      %25 = vector.load %arg12[%24, %c0_14] : memref<8x128xf32, #tpu.memory_space<vmem>>, vector<8x128xf32>
      tpu.vector_store %arg12[%24, %c0_14], %7 {strides = array<i32>} : memref<8x128xf32, #tpu.memory_space<vmem>>, vector<8x128xf32>,
    } else {
    }
    %c0_i32_7 = arith.constant 0 : i32
    %13 = arith.cmpi sgt, %arg1, %c0_i32_7 : i32
    %14 = arith.extui %13 : i1 to i32
    %c0_i32_8 = arith.constant 0 : i32
    %15 = arith.cmpi ne, %14, %c0_i32_8 : i32
    scf.if %15 {
      %24 = arith.index_cast %9 : i32 to index
      %c0_14 = arith.constant 0 : index
      %25 = vector.load %arg12[%24, %c0_14] : memref<8x128xf32, #tpu.memory_space<vmem>>, vector<8x128xf32>
      %26 = arith.addf %25, %7 : vector<8x128xf32>
      %27 = arith.index_cast %9 : i32 to index
      %c0_15 = arith.constant 0 : index
      %28 = vector.load %arg12[%27, %c0_15] : memref<8x128xf32, #tpu.memory_space<vmem>>, vector<8x128xf32>
      tpu.vector_store %arg12[%27, %c0_15], %26 {strides = array<i32>} : memref<8x128xf32, #tpu.memory_space<vmem>>, vector<8x128xf32>,
    } else {
    }
    %c0_i32_9 = arith.constant 0 : i32
    %16 = arith.cmpi eq, %arg1, %c0_i32_9 : i32
    %17 = arith.extui %16 : i1 to i32
    %c0_i32_10 = arith.constant 0 : i32
    %18 = arith.cmpi ne, %17, %c0_i32_10 : i32
    scf.if %18 {
      %24 = arith.index_cast %9 : i32 to index
      %c0_14 = arith.constant 0 : index
      %25 = vector.load %arg12[%24, %c0_14] : memref<8x128xf32, #tpu.memory_space<vmem>>, vector<8x128xf32>
      %c0_15 = arith.constant 0 : index
      %c0_16 = arith.constant 0 : index
      %26 = vector.load %arg13[%c0_15, %c0_16] : memref<1x128xf32, #tpu.memory_space<vmem>>, vector<1x128xf32>
      %cst_17 = arith.constant dense<0.000000e+00> : vector<128xf32>
      %27 = vector.multi_reduction <add>, %25, %cst_17 [0] : vector<8x128xf32> to vector<128xf32>
      %28 = vector.shape_cast %27 : vector<128xf32> to vector<1x128xf32>
      %29 = arith.addf %26, %28 : vector<1x128xf32>
      %c0_18 = arith.constant 0 : index
      %c0_19 = arith.constant 0 : index
      %30 = vector.load %arg13[%c0_18, %c0_19] : memref<1x128xf32, #tpu.memory_space<vmem>>, vector<1x128xf32>
      tpu.vector_store %arg13[%c0_18, %c0_19], %29 {strides = array<i32>} : memref<1x128xf32, #tpu.memory_space<vmem>>, vector<1x128xf32>,
      %c0_20 = arith.constant 0 : index
      %c0_21 = arith.constant 0 : index
      %31 = vector.load %arg14[%c0_20, %c0_21] : memref<1x128xf32, #tpu.memory_space<vmem>>, vector<1x128xf32>
      %32 = arith.mulf %25, %25 : vector<8x128xf32>
      %cst_22 = arith.constant dense<0.000000e+00> : vector<128xf32>
      %33 = vector.multi_reduction <add>, %32, %cst_22 [0] : vector<8x128xf32> to vector<128xf32>
      %34 = vector.shape_cast %33 : vector<128xf32> to vector<1x128xf32>
      %35 = arith.addf %31, %34 : vector<1x128xf32>
      %c0_23 = arith.constant 0 : index
      %c0_24 = arith.constant 0 : index
      %36 = vector.load %arg14[%c0_23, %c0_24] : memref<1x128xf32, #tpu.memory_space<vmem>>, vector<1x128xf32>
      tpu.vector_store %arg14[%c0_23, %c0_24], %35 {strides = array<i32>} : memref<1x128xf32, #tpu.memory_space<vmem>>, vector<1x128xf32>,
    } else {
    }
    %c0_i32_11 = arith.constant 0 : i32
    %19 = arith.cmpi eq, %arg0, %c0_i32_11 : i32
    %c0_i32_12 = arith.constant 0 : i32
    %20 = arith.cmpi eq, %arg1, %c0_i32_12 : i32
    %21 = arith.andi %19, %20 : i1
    %22 = arith.extui %21 : i1 to i32
    %c0_i32_13 = arith.constant 0 : i32
    %23 = arith.cmpi ne, %22, %c0_i32_13 : i32
    scf.if %23 {
      %24 = tpu.iota {dimensions = array<i32: 0>} : vector<8x1xi32>
      %c2_i32 = arith.constant 2 : i32
      %25 = vector.broadcast %c2_i32 : i32 to vector<8x1xi32>
      %26 = arith.cmpi slt, %24, %25 : vector<8x1xi32>
      %c0_14 = arith.constant 0 : index
      %c0_15 = arith.constant 0 : index
      %27 = vector.load %arg4[%c0_14, %c0_15] : memref<1x128xf32, #tpu.memory_space<vmem>>, vector<1x128xf32>
      %c0_16 = arith.constant 0 : index
      %c0_17 = arith.constant 0 : index
      %28 = vector.load %arg5[%c0_16, %c0_17] : memref<1x128xf32, #tpu.memory_space<vmem>>, vector<1x128xf32>
      %c0_18 = arith.constant 0 : index
      %c0_19 = arith.constant 0 : index
      %29 = vector.load %arg13[%c0_18, %c0_19] : memref<1x128xf32, #tpu.memory_space<vmem>>, vector<1x128xf32>
      %cst_20 = arith.constant 5.000000e-01 : f32
      %30 = vector.broadcast %cst_20 : f32 to vector<1x128xf32>
      %31 = arith.mulf %29, %30 : vector<1x128xf32>
      %c0_21 = arith.constant 0 : index
      %c0_22 = arith.constant 0 : index
      %32 = vector.load %arg14[%c0_21, %c0_22] : memref<1x128xf32, #tpu.memory_space<vmem>>, vector<1x128xf32>
      %cst_23 = arith.constant 5.000000e-01 : f32
      %33 = vector.broadcast %cst_23 : f32 to vector<1x128xf32>
      %34 = arith.mulf %32, %33 : vector<1x128xf32>
      %35 = arith.mulf %31, %31 : vector<1x128xf32>
      %36 = arith.subf %34, %35 : vector<1x128xf32>
      %cst_24 = arith.constant 0.000000e+00 : f32
      %37 = vector.broadcast %cst_24 : f32 to vector<1x128xf32>
      %38 = arith.maximumf %36, %37 : vector<1x128xf32>
      %cst_25 = arith.constant 9.99999974E-6 : f32
      %39 = vector.broadcast %cst_25 : f32 to vector<1x128xf32>
      %40 = arith.addf %38, %39 : vector<1x128xf32>
      %41 = math.rsqrt %40 : vector<1x128xf32>
      %42 = arith.mulf %27, %41 : vector<1x128xf32>
      %43 = arith.mulf %31, %42 : vector<1x128xf32>
      %44 = arith.subf %28, %43 : vector<1x128xf32>
      %c0_26 = arith.constant 0 : index
      %c0_27 = arith.constant 0 : index
      %45 = vector.load %arg12[%c0_26, %c0_27] : memref<8x128xf32, #tpu.memory_space<vmem>>, vector<8x128xf32>
      %46 = vector.broadcast %42 : vector<1x128xf32> to vector<8x128xf32>
      %47 = arith.mulf %45, %46 : vector<8x128xf32>
      %48 = vector.broadcast %44 : vector<1x128xf32> to vector<8x128xf32>
      %49 = arith.addf %47, %48 : vector<8x128xf32>
      %cst_28 = arith.constant 0.000000e+00 : f32
      %50 = vector.broadcast %cst_28 : f32 to vector<8x128xf32>
      %51 = arith.cmpf oge, %49, %50 : vector<8x128xf32>
      %cst_29 = arith.constant 0.00999999977 : f32
      %52 = vector.broadcast %cst_29 : f32 to vector<8x128xf32>
      %53 = arith.mulf %52, %49 : vector<8x128xf32>
      %54 = arith.select %51, %49, %53 : vector<8x128xi1>, vector<8x128xf32>
      %c0_30 = arith.constant 0 : index
      %c0_31 = arith.constant 0 : index
      %55 = vector.load %arg6[%c0_30, %c0_31] : memref<128x128xbf16, #tpu.memory_space<vmem>>, vector<128x128xbf16>
      %c0_32 = arith.constant 0 : index
      %c0_33 = arith.constant 0 : index
      %56 = vector.load %arg7[%c0_32, %c0_33] : memref<1x128xf32, #tpu.memory_space<vmem>>, vector<1x128xf32>
      %c0_34 = arith.constant 0 : index
      %c0_35 = arith.constant 0 : index
      %57 = vector.load %arg8[%c0_34, %c0_35] : memref<1x128xf32, #tpu.memory_space<vmem>>, vector<1x128xf32>
      %58 = arith.truncf %54 : vector<8x128xf32> to vector<8x128xbf16>
      %cst_36 = arith.constant dense<0.000000e+00> : vector<8x128xf32>
      %59 = tpu.matmul %58, %55, %cst_36 {dimension_numbers = #tpu.dot_dimension_numbers<[1], [0], [0], [1], [0, 0, 1, 1], [], []>} : vector<8x128xbf16>, vector<128x128xbf16>, vector<8x128xf32> -> vector<8x128xf32>
      %cst_37 = arith.constant 0.000000e+00 : f32
      %60 = vector.shape_cast %26 : vector<8x1xi1> to vector<8x1xi1>
      %61 = vector.broadcast %60 : vector<8x1xi1> to vector<8x128xi1>
      %62 = vector.broadcast %cst_37 : f32 to vector<8x128xf32>
      %63 = arith.select %61, %59, %62 : vector<8x128xi1>, vector<8x128xf32>
      %cst_38 = arith.constant dense<0.000000e+00> : vector<128xf32>
      %64 = vector.multi_reduction <add>, %63, %cst_38 [0] : vector<8x128xf32> to vector<128xf32>
      %65 = vector.shape_cast %64 : vector<128xf32> to vector<1x128xf32>
      %cst_39 = arith.constant 5.000000e-01 : f32
      %66 = vector.broadcast %cst_39 : f32 to vector<1x128xf32>
      %67 = arith.mulf %65, %66 : vector<1x128xf32>
      %68 = vector.broadcast %67 : vector<1x128xf32> to vector<8x128xf32>
      %69 = arith.subf %59, %68 : vector<8x128xf32>
      %cst_40 = arith.constant 0.000000e+00 : f32
      %70 = vector.shape_cast %26 : vector<8x1xi1> to vector<8x1xi1>
      %71 = vector.broadcast %70 : vector<8x1xi1> to vector<8x128xi1>
      %72 = vector.broadcast %cst_40 : f32 to vector<8x128xf32>
      %73 = arith.select %71, %69, %72 : vector<8x128xi1>, vector<8x128xf32>
      %74 = arith.mulf %73, %73 : vector<8x128xf32>
      %cst_41 = arith.constant dense<0.000000e+00> : vector<128xf32>
      %75 = vector.multi_reduction <add>, %74, %cst_41 [0] : vector<8x128xf32> to vector<128xf32>
      %76 = vector.shape_cast %75 : vector<128xf32> to vector<1x128xf32>
      %cst_42 = arith.constant 5.000000e-01 : f32
      %77 = vector.broadcast %cst_42 : f32 to vector<1x128xf32>
      %78 = arith.mulf %76, %77 : vector<1x128xf32>
      %cst_43 = arith.constant 9.99999974E-6 : f32
      %79 = vector.broadcast %cst_43 : f32 to vector<1x128xf32>
      %80 = arith.addf %78, %79 : vector<1x128xf32>
      %81 = math.rsqrt %80 : vector<1x128xf32>
      %82 = arith.mulf %56, %81 : vector<1x128xf32>
      %83 = arith.mulf %67, %82 : vector<1x128xf32>
      %84 = arith.subf %57, %83 : vector<1x128xf32>
      %85 = vector.broadcast %82 : vector<1x128xf32> to vector<8x128xf32>
      %86 = arith.mulf %59, %85 : vector<8x128xf32>
      %87 = vector.broadcast %84 : vector<1x128xf32> to vector<8x128xf32>
      %88 = arith.addf %86, %87 : vector<8x128xf32>
      %cst_44 = arith.constant 0.000000e+00 : f32
      %89 = vector.broadcast %cst_44 : f32 to vector<8x128xf32>
      %90 = arith.cmpf oge, %88, %89 : vector<8x128xf32>
      %cst_45 = arith.constant 0.00999999977 : f32
      %91 = vector.broadcast %cst_45 : f32 to vector<8x128xf32>
      %92 = arith.mulf %91, %88 : vector<8x128xf32>
      %93 = arith.select %90, %88, %92 : vector<8x128xi1>, vector<8x128xf32>
      %c0_46 = arith.constant 0 : index
      %c0_47 = arith.constant 0 : index
      %94 = vector.load %arg9[%c0_46, %c0_47] : memref<128x128xbf16, #tpu.memory_space<vmem>>, vector<128x128xbf16>
      %c0_48 = arith.constant 0 : index
      %c0_49 = arith.constant 0 : index
      %95 = vector.load %arg10[%c0_48, %c0_49] : memref<1x128xf32, #tpu.memory_space<vmem>>, vector<1x128xf32>
      %96 = arith.truncf %93 : vector<8x128xf32> to vector<8x128xbf16>
      %cst_50 = arith.constant dense<0.000000e+00> : vector<8x128xf32>
      %97 = tpu.matmul %96, %94, %cst_50 {dimension_numbers = #tpu.dot_dimension_numbers<[1], [0], [0], [1], [0, 0, 1, 1], [], []>} : vector<8x128xbf16>, vector<128x128xbf16>, vector<8x128xf32> -> vector<8x128xf32>
      %98 = vector.broadcast %95 : vector<1x128xf32> to vector<8x128xf32>
      %99 = arith.addf %97, %98 : vector<8x128xf32>
      %c0_51 = arith.constant 0 : index
      %c0_52 = arith.constant 0 : index
      %100 = vector.load %arg11[%c0_51, %c0_52] : memref<8x128xf32, #tpu.memory_space<vmem>>, vector<8x128xf32>
      tpu.vector_store %arg11[%c0_51, %c0_52], %99 {strides = array<i32>} : memref<8x128xf32, #tpu.memory_space<vmem>>, vector<8x128xf32>,
    } else {
    }
    return
  }
  func.func @transform_0(%arg0: i32, %arg1: i32) -> (i32, i32) {
    %c0_i32 = arith.constant 0 : i32
    return %arg0, %arg1 : i32, i32
  }
  func.func @transform_1(%arg0: i32, %arg1: i32) -> (i32, i32) {
    %c0_i32 = arith.constant 0 : i32
    %c0_i32_0 = arith.constant 0 : i32
    return %arg1, %c0_i32 : i32, i32
  }
  func.func @transform_2(%arg0: i32, %arg1: i32) -> (i32, i32) {
    %c0_i32 = arith.constant 0 : i32
    %c0_i32_0 = arith.constant 0 : i32
    %c0_i32_1 = arith.constant 0 : i32
    return %c0_i32, %c0_i32_0 : i32, i32
  }
  func.func @transform_3(%arg0: i32, %arg1: i32) -> (i32, i32) {
    %c0_i32 = arith.constant 0 : i32
    %c0_i32_0 = arith.constant 0 : i32
    %c0_i32_1 = arith.constant 0 : i32
    return %c0_i32, %c0_i32_0 : i32, i32
  }
  func.func @transform_4(%arg0: i32, %arg1: i32) -> (i32, i32) {
    %c0_i32 = arith.constant 0 : i32
    %c0_i32_0 = arith.constant 0 : i32
    %c0_i32_1 = arith.constant 0 : i32
    return %c0_i32, %c0_i32_0 : i32, i32
  }
  func.func @transform_5(%arg0: i32, %arg1: i32) -> (i32, i32) {
    %c0_i32 = arith.constant 0 : i32
    %c0_i32_0 = arith.constant 0 : i32
    %c0_i32_1 = arith.constant 0 : i32
    return %c0_i32, %c0_i32_0 : i32, i32
  }
  func.func @transform_6(%arg0: i32, %arg1: i32) -> (i32, i32) {
    %c0_i32 = arith.constant 0 : i32
    %c0_i32_0 = arith.constant 0 : i32
    %c0_i32_1 = arith.constant 0 : i32
    return %c0_i32, %c0_i32_0 : i32, i32
  }
  func.func @transform_7(%arg0: i32, %arg1: i32) -> (i32, i32) {
    %c0_i32 = arith.constant 0 : i32
    %c0_i32_0 = arith.constant 0 : i32
    %c0_i32_1 = arith.constant 0 : i32
    return %c0_i32, %c0_i32_0 : i32, i32
  }
  func.func @transform_8(%arg0: i32, %arg1: i32) -> (i32, i32) {
    %c0_i32 = arith.constant 0 : i32
    %c0_i32_0 = arith.constant 0 : i32
    %c0_i32_1 = arith.constant 0 : i32
    return %c0_i32, %c0_i32_0 : i32, i32
  }
  func.func @transform_9(%arg0: i32, %arg1: i32) -> (i32, i32) {
    %c0_i32 = arith.constant 0 : i32
    %c0_i32_0 = arith.constant 0 : i32
    %c0_i32_1 = arith.constant 0 : i32
    return %c0_i32, %c0_i32_0 : i32, i32
  }
}

module attributes {stable_mosaic.version = 11 : i64} {
  func.func @_mlp_kernel(%arg0: i32, %arg1: i32, %arg2: memref<8x1024xbf16, #tpu.memory_space<vmem>>, %arg3: memref<1024x128xbf16, #tpu.memory_space<vmem>>, %arg4: memref<1x128xf32, #tpu.memory_space<vmem>>, %arg5: memref<1x128xf32, #tpu.memory_space<vmem>>, %arg6: memref<128x128xbf16, #tpu.memory_space<vmem>>, %arg7: memref<1x128xf32, #tpu.memory_space<vmem>>, %arg8: memref<1x128xf32, #tpu.memory_space<vmem>>, %arg9: memref<128x128xbf16, #tpu.memory_space<vmem>>, %arg10: memref<1x128xf32, #tpu.memory_space<vmem>>, %arg11: memref<8x128xf32, #tpu.memory_space<vmem>>, %arg12: memref<8x128xf32, #tpu.memory_space<vmem>>, %arg13: memref<1x128xf32, #tpu.memory_space<vmem>>, %arg14: memref<1x128xf32, #tpu.memory_space<vmem>>) attributes {dimension_semantics = [#tpu.dimension_semantics<arbitrary>, #tpu.dimension_semantics<arbitrary>], iteration_bounds = array<i64: 1, 1>, scalar_prefetch = 0 : i64, scratch_operands = 3 : i64, tpu.core_type = #tpu.core_type<tc>, window_params = [{transform_indices = @transform_0, window_bounds = array<i64: 8, 1024>}, {transform_indices = @transform_1, window_bounds = array<i64: 1024, 128>}, {pipeline_mode = #tpu.pipeline_mode<synchronous>, transform_indices = @transform_2, window_bounds = array<i64: 1, 128>}, {pipeline_mode = #tpu.pipeline_mode<synchronous>, transform_indices = @transform_3, window_bounds = array<i64: 1, 128>}, {pipeline_mode = #tpu.pipeline_mode<synchronous>, transform_indices = @transform_4, window_bounds = array<i64: 128, 128>}, {pipeline_mode = #tpu.pipeline_mode<synchronous>, transform_indices = @transform_5, window_bounds = array<i64: 1, 128>}, {pipeline_mode = #tpu.pipeline_mode<synchronous>, transform_indices = @transform_6, window_bounds = array<i64: 1, 128>}, {pipeline_mode = #tpu.pipeline_mode<synchronous>, transform_indices = @transform_7, window_bounds = array<i64: 128, 128>}, {pipeline_mode = #tpu.pipeline_mode<synchronous>, transform_indices = @transform_8, window_bounds = array<i64: 1, 128>}, {pipeline_mode = #tpu.pipeline_mode<synchronous>, transform_indices = @transform_9, window_bounds = array<i64: 8, 128>}]} {
    %c0_i32 = arith.constant 0 : i32
    %0 = arith.cmpi eq, %arg0, %c0_i32 : i32
    %c0_i32_0 = arith.constant 0 : i32
    %1 = arith.cmpi eq, %arg1, %c0_i32_0 : i32
    %2 = arith.andi %0, %1 : i1
    %3 = arith.extui %2 : i1 to i32
    %c0_i32_1 = arith.constant 0 : i32
    %4 = arith.cmpi ne, %3, %c0_i32_1 : i32
    scf.if %4 {
      %cst_14 = arith.constant 0.000000e+00 : f32
      %24 = vector.broadcast %cst_14 : f32 to vector<1x128xf32>
      %c0_15 = arith.constant 0 : index
      %c0_16 = arith.constant 0 : index
      %25 = vector.load %arg13[%c0_15, %c0_16] : memref<1x128xf32, #tpu.memory_space<vmem>>, vector<1x128xf32>
      tpu.vector_store %arg13[%c0_15, %c0_16], %24 {strides = array<i32>} : memref<1x128xf32, #tpu.memory_space<vmem>>, vector<1x128xf32>,
      %cst_17 = arith.constant 0.000000e+00 : f32
      %26 = vector.broadcast %cst_17 : f32 to vector<1x128xf32>
      %c0_18 = arith.constant 0 : index
      %c0_19 = arith.constant 0 : index
      %27 = vector.load %arg14[%c0_18, %c0_19] : memref<1x128xf32, #tpu.memory_space<vmem>>, vector<1x128xf32>
      tpu.vector_store %arg14[%c0_18, %c0_19], %26 {strides = array<i32>} : memref<1x128xf32, #tpu.memory_space<vmem>>, vector<1x128xf32>,
    } else {
    }
    %c0 = arith.constant 0 : index
    %c0_2 = arith.constant 0 : index
    %5 = vector.load %arg2[%c0, %c0_2] : memref<8x1024xbf16, #tpu.memory_space<vmem>>, vector<8x1024xbf16>
    %c0_3 = arith.constant 0 : index
    %c0_4 = arith.constant 0 : index
    %6 = vector.load %arg3[%c0_3, %c0_4] : memref<1024x128xbf16, #tpu.memory_space<vmem>>, vector<1024x128xbf16>
    %cst = arith.constant dense<0.000000e+00> : vector<8x128xf32>
    %7 = tpu.matmul %5, %6, %cst {dimension_numbers = #tpu.dot_dimension_numbers<[1], [0], [0], [1], [0, 0, 1, 1], [], []>} : vector<8x1024xbf16>, vector<1024x128xbf16>, vector<8x128xf32> -> vector<8x128xf32>
    %c8_i32 = arith.constant 8 : i32
    %8 = arith.muli %arg0, %c8_i32 : i32
    %9 = tpu.assume_multiple %8, 8 : i32
    %c0_i32_5 = arith.constant 0 : i32
    %10 = arith.cmpi eq, %arg1, %c0_i32_5 : i32
    %11 = arith.extui %10 : i1 to i32
    %c0_i32_6 = arith.constant 0 : i32
    %12 = arith.cmpi ne, %11, %c0_i32_6 : i32
    scf.if %12 {
      %24 = arith.index_cast %9 : i32 to index
      %c0_14 = arith.constant 0 : index
      %25 = vector.load %arg12[%24, %c0_14] : memref<8x128xf32, #tpu.memory_space<vmem>>, vector<8x128xf32>
      tpu.vector_store %arg12[%24, %c0_14], %7 {strides = array<i32>} : memref<8x128xf32, #tpu.memory_space<vmem>>, vector<8x128xf32>,
    } else {
    }
    %c0_i32_7 = arith.constant 0 : i32
    %13 = arith.cmpi sgt, %arg1, %c0_i32_7 : i32
    %14 = arith.extui %13 : i1 to i32
    %c0_i32_8 = arith.constant 0 : i32
    %15 = arith.cmpi ne, %14, %c0_i32_8 : i32
    scf.if %15 {
      %24 = arith.index_cast %9 : i32 to index
      %c0_14 = arith.constant 0 : index
      %25 = vector.load %arg12[%24, %c0_14] : memref<8x128xf32, #tpu.memory_space<vmem>>, vector<8x128xf32>
      %26 = arith.addf %25, %7 : vector<8x128xf32>
      %27 = arith.index_cast %9 : i32 to index
      %c0_15 = arith.constant 0 : index
      %28 = vector.load %arg12[%27, %c0_15] : memref<8x128xf32, #tpu.memory_space<vmem>>, vector<8x128xf32>
      tpu.vector_store %arg12[%27, %c0_15], %26 {strides = array<i32>} : memref<8x128xf32, #tpu.memory_space<vmem>>, vector<8x128xf32>,
    } else {
    }
    %c0_i32_9 = arith.constant 0 : i32
    %16 = arith.cmpi eq, %arg1, %c0_i32_9 : i32
    %17 = arith.extui %16 : i1 to i32
    %c0_i32_10 = arith.constant 0 : i32
    %18 = arith.cmpi ne, %17, %c0_i32_10 : i32
    scf.if %18 {
      %24 = arith.index_cast %9 : i32 to index
      %c0_14 = arith.constant 0 : index
      %25 = vector.load %arg12[%24, %c0_14] : memref<8x128xf32, #tpu.memory_space<vmem>>, vector<8x128xf32>
      %c0_15 = arith.constant 0 : index
      %c0_16 = arith.constant 0 : index
      %26 = vector.load %arg13[%c0_15, %c0_16] : memref<1x128xf32, #tpu.memory_space<vmem>>, vector<1x128xf32>
      %cst_17 = arith.constant dense<0.000000e+00> : vector<128xf32>
      %27 = vector.multi_reduction <add>, %25, %cst_17 [0] : vector<8x128xf32> to vector<128xf32>
      %28 = vector.shape_cast %27 : vector<128xf32> to vector<1x128xf32>
      %29 = arith.addf %26, %28 : vector<1x128xf32>
      %c0_18 = arith.constant 0 : index
      %c0_19 = arith.constant 0 : index
      %30 = vector.load %arg13[%c0_18, %c0_19] : memref<1x128xf32, #tpu.memory_space<vmem>>, vector<1x128xf32>
      tpu.vector_store %arg13[%c0_18, %c0_19], %29 {strides = array<i32>} : memref<1x128xf32, #tpu.memory_space<vmem>>, vector<1x128xf32>,
      %c0_20 = arith.constant 0 : index
      %c0_21 = arith.constant 0 : index
      %31 = vector.load %arg14[%c0_20, %c0_21] : memref<1x128xf32, #tpu.memory_space<vmem>>, vector<1x128xf32>
      %32 = arith.mulf %25, %25 : vector<8x128xf32>
      %cst_22 = arith.constant dense<0.000000e+00> : vector<128xf32>
      %33 = vector.multi_reduction <add>, %32, %cst_22 [0] : vector<8x128xf32> to vector<128xf32>
      %34 = vector.shape_cast %33 : vector<128xf32> to vector<1x128xf32>
      %35 = arith.addf %31, %34 : vector<1x128xf32>
      %c0_23 = arith.constant 0 : index
      %c0_24 = arith.constant 0 : index
      %36 = vector.load %arg14[%c0_23, %c0_24] : memref<1x128xf32, #tpu.memory_space<vmem>>, vector<1x128xf32>
      tpu.vector_store %arg14[%c0_23, %c0_24], %35 {strides = array<i32>} : memref<1x128xf32, #tpu.memory_space<vmem>>, vector<1x128xf32>,
    } else {
    }
    %c0_i32_11 = arith.constant 0 : i32
    %19 = arith.cmpi eq, %arg0, %c0_i32_11 : i32
    %c0_i32_12 = arith.constant 0 : i32
    %20 = arith.cmpi eq, %arg1, %c0_i32_12 : i32
    %21 = arith.andi %19, %20 : i1
    %22 = arith.extui %21 : i1 to i32
    %c0_i32_13 = arith.constant 0 : i32
    %23 = arith.cmpi ne, %22, %c0_i32_13 : i32
    scf.if %23 {
      %24 = tpu.iota {dimensions = array<i32: 0>} : vector<8x1xi32>
      %c2_i32 = arith.constant 2 : i32
      %25 = vector.broadcast %c2_i32 : i32 to vector<8x1xi32>
      %26 = arith.cmpi slt, %24, %25 : vector<8x1xi32>
      %c0_14 = arith.constant 0 : index
      %c0_15 = arith.constant 0 : index
      %27 = vector.load %arg4[%c0_14, %c0_15] : memref<1x128xf32, #tpu.memory_space<vmem>>, vector<1x128xf32>
      %c0_16 = arith.constant 0 : index
      %c0_17 = arith.constant 0 : index
      %28 = vector.load %arg5[%c0_16, %c0_17] : memref<1x128xf32, #tpu.memory_space<vmem>>, vector<1x128xf32>
      %c0_18 = arith.constant 0 : index
      %c0_19 = arith.constant 0 : index
      %29 = vector.load %arg13[%c0_18, %c0_19] : memref<1x128xf32, #tpu.memory_space<vmem>>, vector<1x128xf32>
      %cst_20 = arith.constant 5.000000e-01 : f32
      %30 = vector.broadcast %cst_20 : f32 to vector<1x128xf32>
      %31 = arith.mulf %29, %30 : vector<1x128xf32>
      %c0_21 = arith.constant 0 : index
      %c0_22 = arith.constant 0 : index
      %32 = vector.load %arg14[%c0_21, %c0_22] : memref<1x128xf32, #tpu.memory_space<vmem>>, vector<1x128xf32>
      %cst_23 = arith.constant 5.000000e-01 : f32
      %33 = vector.broadcast %cst_23 : f32 to vector<1x128xf32>
      %34 = arith.mulf %32, %33 : vector<1x128xf32>
      %35 = arith.mulf %31, %31 : vector<1x128xf32>
      %36 = arith.subf %34, %35 : vector<1x128xf32>
      %cst_24 = arith.constant 0.000000e+00 : f32
      %37 = vector.broadcast %cst_24 : f32 to vector<1x128xf32>
      %38 = arith.maximumf %36, %37 : vector<1x128xf32>
      %cst_25 = arith.constant 9.99999974E-6 : f32
      %39 = vector.broadcast %cst_25 : f32 to vector<1x128xf32>
      %40 = arith.addf %38, %39 : vector<1x128xf32>
      %41 = math.rsqrt %40 : vector<1x128xf32>
      %42 = arith.mulf %27, %41 : vector<1x128xf32>
      %43 = arith.mulf %31, %42 : vector<1x128xf32>
      %44 = arith.subf %28, %43 : vector<1x128xf32>
      %c0_26 = arith.constant 0 : index
      %c0_27 = arith.constant 0 : index
      %45 = vector.load %arg12[%c0_26, %c0_27] : memref<8x128xf32, #tpu.memory_space<vmem>>, vector<8x128xf32>
      %46 = vector.broadcast %42 : vector<1x128xf32> to vector<8x128xf32>
      %47 = arith.mulf %45, %46 : vector<8x128xf32>
      %48 = vector.broadcast %44 : vector<1x128xf32> to vector<8x128xf32>
      %49 = arith.addf %47, %48 : vector<8x128xf32>
      %cst_28 = arith.constant 0.000000e+00 : f32
      %50 = vector.broadcast %cst_28 : f32 to vector<8x128xf32>
      %51 = arith.cmpf oge, %49, %50 : vector<8x128xf32>
      %cst_29 = arith.constant 0.00999999977 : f32
      %52 = vector.broadcast %cst_29 : f32 to vector<8x128xf32>
      %53 = arith.mulf %52, %49 : vector<8x128xf32>
      %54 = arith.select %51, %49, %53 : vector<8x128xi1>, vector<8x128xf32>
      %c0_30 = arith.constant 0 : index
      %c0_31 = arith.constant 0 : index
      %55 = vector.load %arg6[%c0_30, %c0_31] : memref<128x128xbf16, #tpu.memory_space<vmem>>, vector<128x128xbf16>
      %c0_32 = arith.constant 0 : index
      %c0_33 = arith.constant 0 : index
      %56 = vector.load %arg7[%c0_32, %c0_33] : memref<1x128xf32, #tpu.memory_space<vmem>>, vector<1x128xf32>
      %c0_34 = arith.constant 0 : index
      %c0_35 = arith.constant 0 : index
      %57 = vector.load %arg8[%c0_34, %c0_35] : memref<1x128xf32, #tpu.memory_space<vmem>>, vector<1x128xf32>
      %58 = arith.truncf %54 : vector<8x128xf32> to vector<8x128xbf16>
      %cst_36 = arith.constant dense<0.000000e+00> : vector<8x128xf32>
      %59 = tpu.matmul %58, %55, %cst_36 {dimension_numbers = #tpu.dot_dimension_numbers<[1], [0], [0], [1], [0, 0, 1, 1], [], []>} : vector<8x128xbf16>, vector<128x128xbf16>, vector<8x128xf32> -> vector<8x128xf32>
      %cst_37 = arith.constant 0.000000e+00 : f32
      %60 = vector.shape_cast %26 : vector<8x1xi1> to vector<8x1xi1>
      %61 = vector.broadcast %60 : vector<8x1xi1> to vector<8x128xi1>
      %62 = vector.broadcast %cst_37 : f32 to vector<8x128xf32>
      %63 = arith.select %61, %59, %62 : vector<8x128xi1>, vector<8x128xf32>
      %cst_38 = arith.constant dense<0.000000e+00> : vector<128xf32>
      %64 = vector.multi_reduction <add>, %63, %cst_38 [0] : vector<8x128xf32> to vector<128xf32>
      %65 = vector.shape_cast %64 : vector<128xf32> to vector<1x128xf32>
      %cst_39 = arith.constant 5.000000e-01 : f32
      %66 = vector.broadcast %cst_39 : f32 to vector<1x128xf32>
      %67 = arith.mulf %65, %66 : vector<1x128xf32>
      %68 = vector.broadcast %67 : vector<1x128xf32> to vector<8x128xf32>
      %69 = arith.subf %59, %68 : vector<8x128xf32>
      %cst_40 = arith.constant 0.000000e+00 : f32
      %70 = vector.shape_cast %26 : vector<8x1xi1> to vector<8x1xi1>
      %71 = vector.broadcast %70 : vector<8x1xi1> to vector<8x128xi1>
      %72 = vector.broadcast %cst_40 : f32 to vector<8x128xf32>
      %73 = arith.select %71, %69, %72 : vector<8x128xi1>, vector<8x128xf32>
      %74 = arith.mulf %73, %73 : vector<8x128xf32>
      %cst_41 = arith.constant dense<0.000000e+00> : vector<128xf32>
      %75 = vector.multi_reduction <add>, %74, %cst_41 [0] : vector<8x128xf32> to vector<128xf32>
      %76 = vector.shape_cast %75 : vector<128xf32> to vector<1x128xf32>
      %cst_42 = arith.constant 5.000000e-01 : f32
      %77 = vector.broadcast %cst_42 : f32 to vector<1x128xf32>
      %78 = arith.mulf %76, %77 : vector<1x128xf32>
      %cst_43 = arith.constant 9.99999974E-6 : f32
      %79 = vector.broadcast %cst_43 : f32 to vector<1x128xf32>
      %80 = arith.addf %78, %79 : vector<1x128xf32>
      %81 = math.rsqrt %80 : vector<1x128xf32>
      %82 = arith.mulf %56, %81 : vector<1x128xf32>
      %83 = arith.mulf %67, %82 : vector<1x128xf32>
      %84 = arith.subf %57, %83 : vector<1x128xf32>
      %85 = vector.broadcast %82 : vector<1x128xf32> to vector<8x128xf32>
      %86 = arith.mulf %59, %85 : vector<8x128xf32>
      %87 = vector.broadcast %84 : vector<1x128xf32> to vector<8x128xf32>
      %88 = arith.addf %86, %87 : vector<8x128xf32>
      %cst_44 = arith.constant 0.000000e+00 : f32
      %89 = vector.broadcast %cst_44 : f32 to vector<8x128xf32>
      %90 = arith.cmpf oge, %88, %89 : vector<8x128xf32>
      %cst_45 = arith.constant 0.00999999977 : f32
      %91 = vector.broadcast %cst_45 : f32 to vector<8x128xf32>
      %92 = arith.mulf %91, %88 : vector<8x128xf32>
      %93 = arith.select %90, %88, %92 : vector<8x128xi1>, vector<8x128xf32>
      %c0_46 = arith.constant 0 : index
      %c0_47 = arith.constant 0 : index
      %94 = vector.load %arg9[%c0_46, %c0_47] : memref<128x128xbf16, #tpu.memory_space<vmem>>, vector<128x128xbf16>
      %c0_48 = arith.constant 0 : index
      %c0_49 = arith.constant 0 : index
      %95 = vector.load %arg10[%c0_48, %c0_49] : memref<1x128xf32, #tpu.memory_space<vmem>>, vector<1x128xf32>
      %96 = arith.truncf %93 : vector<8x128xf32> to vector<8x128xbf16>
      %cst_50 = arith.constant dense<0.000000e+00> : vector<8x128xf32>
      %97 = tpu.matmul %96, %94, %cst_50 {dimension_numbers = #tpu.dot_dimension_numbers<[1], [0], [0], [1], [0, 0, 1, 1], [], []>} : vector<8x128xbf16>, vector<128x128xbf16>, vector<8x128xf32> -> vector<8x128xf32>
      %98 = vector.broadcast %95 : vector<1x128xf32> to vector<8x128xf32>
      %99 = arith.addf %97, %98 : vector<8x128xf32>
      %c0_51 = arith.constant 0 : index
      %c0_52 = arith.constant 0 : index
      %100 = vector.load %arg11[%c0_51, %c0_52] : memref<8x128xf32, #tpu.memory_space<vmem>>, vector<8x128xf32>
      tpu.vector_store %arg11[%c0_51, %c0_52], %99 {strides = array<i32>} : memref<8x128xf32, #tpu.memory_space<vmem>>, vector<8x128xf32>,
    } else {
    }
    return
  }
  func.func @transform_0(%arg0: i32, %arg1: i32) -> (i32, i32) {
    %c0_i32 = arith.constant 0 : i32
    return %arg0, %arg1 : i32, i32
  }
  func.func @transform_1(%arg0: i32, %arg1: i32) -> (i32, i32) {
    %c0_i32 = arith.constant 0 : i32
    %c0_i32_0 = arith.constant 0 : i32
    return %arg1, %c0_i32 : i32, i32
  }
  func.func @transform_2(%arg0: i32, %arg1: i32) -> (i32, i32) {
    %c0_i32 = arith.constant 0 : i32
    %c0_i32_0 = arith.constant 0 : i32
    %c0_i32_1 = arith.constant 0 : i32
    return %c0_i32, %c0_i32_0 : i32, i32
  }
  func.func @transform_3(%arg0: i32, %arg1: i32) -> (i32, i32) {
    %c0_i32 = arith.constant 0 : i32
    %c0_i32_0 = arith.constant 0 : i32
    %c0_i32_1 = arith.constant 0 : i32
    return %c0_i32, %c0_i32_0 : i32, i32
  }
  func.func @transform_4(%arg0: i32, %arg1: i32) -> (i32, i32) {
    %c0_i32 = arith.constant 0 : i32
    %c0_i32_0 = arith.constant 0 : i32
    %c0_i32_1 = arith.constant 0 : i32
    return %c0_i32, %c0_i32_0 : i32, i32
  }
  func.func @transform_5(%arg0: i32, %arg1: i32) -> (i32, i32) {
    %c0_i32 = arith.constant 0 : i32
    %c0_i32_0 = arith.constant 0 : i32
    %c0_i32_1 = arith.constant 0 : i32
    return %c0_i32, %c0_i32_0 : i32, i32
  }
  func.func @transform_6(%arg0: i32, %arg1: i32) -> (i32, i32) {
    %c0_i32 = arith.constant 0 : i32
    %c0_i32_0 = arith.constant 0 : i32
    %c0_i32_1 = arith.constant 0 : i32
    return %c0_i32, %c0_i32_0 : i32, i32
  }
  func.func @transform_7(%arg0: i32, %arg1: i32) -> (i32, i32) {
    %c0_i32 = arith.constant 0 : i32
    %c0_i32_0 = arith.constant 0 : i32
    %c0_i32_1 = arith.constant 0 : i32
    return %c0_i32, %c0_i32_0 : i32, i32
  }
  func.func @transform_8(%arg0: i32, %arg1: i32) -> (i32, i32) {
    %c0_i32 = arith.constant 0 : i32
    %c0_i32_0 = arith.constant 0 : i32
    %c0_i32_1 = arith.constant 0 : i32
    return %c0_i32, %c0_i32_0 : i32, i32
  }
  func.func @transform_9(%arg0: i32, %arg1: i32) -> (i32, i32) {
    %c0_i32 = arith.constant 0 : i32
    %c0_i32_0 = arith.constant 0 : i32
    %c0_i32_1 = arith.constant 0 : i32
    return %c0_i32, %c0_i32_0 : i32, i32
  }
}

</mosaic_0001>

<bundles_post_ra>
// kernel: tpu_custom_call.1
= control target key start
LH: loop header
LB: loop body
LE: loop exit
PB: predicated region body
PF: predicated region fallthrough
CT: control target
= control target key end

     0   :  { %14 = vsyncpa [#allocation6], 0  ;;  %s1776_s0 = inlined_call_operand.hbm [shape: bf16[8,1024], index: 0, kind: input, shape index: {}]   ;;  %s1777_s1 = inlined_call_operand.hbm [shape: bf16[1024,128], index: 1, kind: input, shape index: {}]   ;;  %s1778_s2 = inlined_call_operand.vmem [shape: f32[1,128], index: 2, kind: input, shape index: {}]   ;;  %s1779_s3 = inlined_call_operand.vmem [shape: f32[1,128], index: 3, kind: input, shape index: {}]   ;;  %s1780_s4 = inlined_call_operand.hbm [shape: bf16[128,128], index: 4, kind: input, shape index: {}]   ;;  %s1781_s5 = inlined_call_operand.vmem [shape: f32[1,128], index: 5, kind: input, shape index: {}]   ;;  %s1782_s6 = inlined_call_operand.vmem [shape: f32[1,128], index: 6, kind: input, shape index: {}]   ;;  %s1783_s7 = inlined_call_operand.hbm [shape: bf16[128,128], index: 7, kind: input, shape index: {}]   ;;  %s1784_s8 = inlined_call_operand.vmem [shape: f32[1,128], index: 8, kind: input, shape index: {}]   ;;  %s1785_s9 = inlined_call_operand.hbm [shape: f32[8,128], index: 9, kind: output, shape index: {}]  }
   0x1   :  { %15 = vsyncpa [#allocation9], 0 }
   0x2   :  { %16 = vsyncpa [#allocation12], 0 }
   0x3   :  { %17 = vsyncpa [#allocation7], 0  ;;  %s1607_s30 = smov [#allocation8]   ;;  %s1489_s13 = scalar_lea.hbm %s1777_s1, 8192 }
   0x4   :  { %s33_s10 = sshll.u32 %s1607_s30, 4  ;;  %p1490_p0 = scmp.ne.s32.totalorder %s1777_s1, %s1489_s13  ;;  %s34_s10 = int_to_ptr.vmem [resolvable:$true] %s33_s10 }
   0x5   :  { %p1493_p1 = scmp.lt.u32.totalorder %s1489_s13, %s1777_s1 }
   0x7   :  { %p1495_p2 = pnand %p1493_p1, %p1490_p0 }
   0x9   :  { %1498 = shalt.err (!%p1495_p2)
}
   0xa   :  { %s1499_s18 = scalar_lea.vmem %s34_s10, 8192  ;;  %p1504_p4 = scmp.lt.s32.totalorder %s34_s10, %s34_s10 }
   0xb   :  { %p1500_p3 = scmp.ne.s32.totalorder %s34_s10, %s1499_s18  ;;  %p1505_p5 = scmp.lt.s32.totalorder %s1499_s18, %s1499_s18 }
   0xd   :  { %p1506_p6 = por %p1505_p5, %p1504_p4 }
   0xf   :  { %p1507_p7 = pnand %p1506_p6, %p1500_p3 }
  0x11   :  { %1510 = shalt.err (!%p1507_p7)
}
  0x12   :  { %s1608_s19 = smov 64   ;;  %s1609_s20 = smov 4  }
  0x13   :  { %39 = dma.hbm_to_vmem [thread:$0]  %s1777_s1, 8192, %s34_s10, [#allocation9], %s1608_s19, %s1608_s19, %s1609_s20  }
  0x14   :  { %s1610_s23 = smov [#allocation5]   ;;  %s1611_s25 = smov [#allocation10]  }
  0x15   :  { %s24_s24 = sshll.u32 %s1610_s23, 4  ;;  %s49_s26 = sshll.u32 %s1611_s25, 4  ;;  %s25_s24 = int_to_ptr.vmem [resolvable:$true] %s24_s24  ;;  %s50_s26 = int_to_ptr.vmem [resolvable:$true] %s49_s26 }
  0x16   :  { %s1511_s29 = scalar_lea.hbm %s1776_s0, 512 }
  0x17   :  { %p1512_p8 = scmp.ne.s32.totalorder %s1776_s0, %s1511_s29  ;;  %p1515_p9 = scmp.lt.u32.totalorder %s1511_s29, %s1776_s0 }
  0x19   :  { %p1517_p10 = pnand %p1515_p9, %p1512_p8 }
  0x1b   :  { %1520 = shalt.err (!%p1517_p10)
}
  0x1c   :  { %s1521_s1 = scalar_lea.vmem %s25_s24, 512  ;;  %p1526_p12 = scmp.lt.s32.totalorder %s25_s24, %s25_s24 }
  0x1d   :  { %p1522_p11 = scmp.ne.s32.totalorder %s25_s24, %s1521_s1  ;;  %p1527_p13 = scmp.lt.s32.totalorder %s1521_s1, %s1521_s1 }
  0x1f   :  { %p1528_p0 = por %p1527_p13, %p1526_p12 }
  0x21   :  { %p1529_p1 = pnand %p1528_p0, %p1522_p11 }
  0x23   :  { %1532 = shalt.err (!%p1529_p1)
}
  0x24   :  { %27 = dma.hbm_to_vmem [thread:$0]  %s1776_s0, 512, %s25_s24, [#allocation6]  }
  0x25   :  { %s1533_s17 = scalar_lea.hbm %s1780_s4, 1024 }
  0x26   :  { %p1534_p2 = scmp.ne.s32.totalorder %s1780_s4, %s1533_s17  ;;  %p1537_p3 = scmp.lt.u32.totalorder %s1533_s17, %s1780_s4 }
  0x28   :  { %p1539_p4 = pnand %p1537_p3, %p1534_p2 }
  0x2a   :  { %1542 = shalt.err (!%p1539_p4)
}
  0x2b   :  { %s1543_s25 = scalar_lea.vmem %s50_s26, 1024  ;;  %p1548_p6 = scmp.lt.s32.totalorder %s50_s26, %s50_s26 }
  0x2c   :  { %p1544_p5 = scmp.ne.s32.totalorder %s50_s26, %s1543_s25  ;;  %p1549_p7 = scmp.lt.s32.totalorder %s1543_s25, %s1543_s25 }
  0x2e   :  { %p1550_p8 = por %p1549_p7, %p1548_p6 }
  0x30   :  { %p1551_p9 = pnand %p1550_p8, %p1544_p5 }
  0x32   :  { %1554 = shalt.err (!%p1551_p9)
}
  0x33   :  { %55 = dma.hbm_to_vmem [thread:$0]  %s1780_s4, 1024, %s50_s26, [#allocation9], %s1608_s19, %s1608_s19, %s1609_s20  }
  0x34   :  { %s1612_s27 = smov [#allocation11]   ;;  %s1555_s11 = scalar_lea.hbm %s1783_s7, 1024 }
  0x35   :  { %s65_s28 = sshll.u32 %s1612_s27, 4  ;;  %p1556_p10 = scmp.ne.s32.totalorder %s1783_s7, %s1555_s11  ;;  %s66_s28 = int_to_ptr.vmem [resolvable:$true] %s65_s28 }
  0x36   :  { %p1559_p11 = scmp.lt.u32.totalorder %s1555_s11, %s1783_s7 }
  0x38   :  { %p1561_p12 = pnand %p1559_p11, %p1556_p10 }
  0x3a   :  { %1564 = shalt.err (!%p1561_p12)
}
  0x3b   :  { %s1565_s14 = scalar_lea.vmem %s66_s28, 1024  ;;  %p1570_p0 = scmp.lt.s32.totalorder %s66_s28, %s66_s28 }
  0x3c   :  { %p1566_p13 = scmp.ne.s32.totalorder %s66_s28, %s1565_s14  ;;  %p1571_p1 = scmp.lt.s32.totalorder %s1565_s14, %s1565_s14 }
  0x3e   :  { %p1572_p2 = por %p1571_p1, %p1570_p0 }
  0x40   :  { %p1573_p3 = pnand %p1572_p2, %p1566_p13 }
  0x42   :  { %1576 = shalt.err (!%p1573_p3)
}
  0x43   :  { %71 = dma.hbm_to_vmem [thread:$0]  %s1783_s7, 1024, %s66_s28, [#allocation12], %s1608_s19, %s1608_s19, %s1609_s20  }
  0x44   :  { %1599 = dma.done.wait [#allocation6], 512  }
  0x45   :  { %1600 = vsyncadd [#allocation6], 4294966784 }
  0x46   :  { %1601 = dma.done.wait [#allocation9], 9216  }
  0x47   :  { %1602 = vsyncadd [#allocation9], 4294958080 }
  0x48   :  { %1603 = dma.done.wait [#allocation12], 1024  }
  0x49   :  { %1604 = vsyncadd [#allocation12], 4294966272  ;;  %v1397_v0 = vld [vmem:[#allocation8 + $0x40] sm:$0xff]   ;;  %v1401_v4 = vld [vmem:[#allocation8 + $0x48] sm:$0xff]   ;;  %vm1614_vm0 = vmmov 0   ;;  %s1615_s21 = smov [#allocation13]  }
  0x4a   :  { %v1398_v1 = vld [vmem:[#allocation8 + $0xc0] sm:$0xff]   ;;  %1242 = vmatprep.subr.bf16.mxu0 %v1397_v0  ;;  %v1402_v5 = vld [vmem:[#allocation8 + $0xc8] sm:$0xff]   ;;  %v1405_v8 = vld [vmem:[#allocation8 + $0x50] sm:$0xff]   ;;  %s1142_s22 = sshll.u32 %s1615_s21, 4  ;;  %s1143_s22 = int_to_ptr.vmem [resolvable:$true] %s1142_s22 }
  0x4b   :  { %v1399_v2 = vld [vmem:[#allocation8] sm:$0xff]   ;;  %1264 = vmatprep.subr.bf16.mxu1 %v1398_v1  ;;  %v1403_v6 = vld [vmem:[#allocation8 + $0x8] sm:$0xff]   ;;  %v1406_v9 = vld [vmem:[#allocation8 + $0xd0] sm:$0xff]   ;;  %p1582_p5 = scmp.lt.s32.totalorder %s1143_s22, %s1143_s22 }
  0x4c   :  { %v1400_v3 = vld [vmem:[#allocation8 + $0x80] sm:$0xff]   ;;  %1243 = vmatpush3.bf16.msra.mxu0 %v1399_v2  ;;  %v1404_v7 = vld [vmem:[#allocation8 + $0x88] sm:$0xff]   ;;  %v1407_v10 = vld [vmem:[#allocation8 + $0x10] sm:$0xff]  }
  0x4d   :  { %1265 = vmatpush3.bf16.msra.mxu1 %v1400_v3  ;;  %1244 = vmatprep.subr.bf16.mxu0 %v1401_v4  ;;  %v1408_v11 = vld [vmem:[#allocation8 + $0x90] sm:$0xff]   ;;  %v1409_v12 = vld [vmem:[#allocation8 + $0x58] sm:$0xff]   ;;  %v1413_v16 = vld [vmem:[#allocation8 + $0x60] sm:$0xff]  }
  0x4e   :  { %1266 = vmatprep.subr.bf16.mxu1 %v1402_v5  ;;  %v1410_v13 = vld [vmem:[#allocation8 + $0xd8] sm:$0xff]   ;;  %v1414_v17 = vld [vmem:[#allocation8 + $0xe0] sm:$0xff]   ;;  %v1417_v20 = vld [vmem:[#allocation8 + $0x68] sm:$0xff]  }
  0x4f   :  { %v1411_v14 = vld [vmem:[#allocation8 + $0x18] sm:$0xff]   ;;  %v1415_v18 = vld [vmem:[#allocation8 + $0x20] sm:$0xff]   ;;  %v1418_v21 = vld [vmem:[#allocation8 + $0xe8] sm:$0xff]  }
  0x50   :  { %1245 = vmatpush3.bf16.msra.mxu0 %v1403_v6  ;;  %v1412_v15 = vld [vmem:[#allocation8 + $0x98] sm:$0xff]   ;;  %v1416_v19 = vld [vmem:[#allocation8 + $0xa0] sm:$0xff]   ;;  %v1419_v22 = vld [vmem:[#allocation8 + $0x28] sm:$0xff]  }
  0x51   :  { %1267 = vmatpush3.bf16.msra.mxu1 %v1404_v7  ;;  %1246 = vmatprep.subr.bf16.mxu0 %v1405_v8  ;;  %v1420_v23 = vld [vmem:[#allocation8 + $0xa8] sm:$0xff]   ;;  %v1421_v24 = vld [vmem:[#allocation8 + $0x70] sm:$0xff]   ;;  %v1425_v28 = vld [vmem:[#allocation8 + $0x78] sm:$0xff]  }
  0x52   :  { %1268 = vmatprep.subr.bf16.mxu1 %v1406_v9  ;;  %v1422_v25 = vld [vmem:[#allocation8 + $0xf0] sm:$0xff]   ;;  %v1426_v29 = vld [vmem:[#allocation8 + $0xf8] sm:$0xff]   ;;  %v95_v32 = vld [vmem:[#allocation5] sm:$0xff] }
  0x53   :  { %v1423_v26 = vld [vmem:[#allocation8 + $0x30] sm:$0xff]   ;;  %v1427_v30 = vld [vmem:[#allocation8 + $0x38] sm:$0xff]   ;;  %v96_v33 = vld [vmem:[#allocation5 + $0x8] sm:$0xff]  ;;  %v1153_v34 = vcombine.low %v95_v32, %v95_v32  ;;  %v1154_v35 = vcombine.high %v95_v32, %v95_v32 }
  0x54   :  { %1247 = vmatpush3.bf16.msra.mxu0 %v1407_v10  ;;  %v1424_v27 = vld [vmem:[#allocation8 + $0xb0] sm:$0xff]   ;;  %v1428_v31 = vld [vmem:[#allocation8 + $0xb8] sm:$0xff]   ;;  %v1155_v36 = vcombine.low %v96_v33, %v96_v33  ;;  %v1156_v37 = vcombine.high %v96_v33, %v96_v33  ;;  %v1433_v38 = vld [vmem:[#allocation8 + $0x140] sm:$0xff]  }
  0x55   :  { %1269 = vmatpush3.bf16.msra.mxu1 %v1408_v11  ;;  %1248 = vmatprep.subr.bf16.mxu0 %v1409_v12  ;;  %v1434_v39 = vld [vmem:[#allocation8 + $0x1c0] sm:$0xff]   ;;  %v1437_v42 = vld [vmem:[#allocation8 + $0x148] sm:$0xff]   ;;  %v1441_v46 = vld [vmem:[#allocation8 + $0x150] sm:$0xff]   ;;  %v1613_v12 = vmov 0.0  }
  0x56   :  { %1270 = vmatprep.subr.bf16.mxu1 %v1410_v13  ;;  %671 = vmatprep.mubr.bf16.mxu0 %v1154_v35  ;;  %v1435_v40 = vld [vmem:[#allocation8 + $0x100] sm:$0xff]   ;;  %v1438_v43 = vld [vmem:[#allocation8 + $0x1c8] sm:$0xff]   ;;  %v1442_v47 = vld [vmem:[#allocation8 + $0x1d0] sm:$0xff]   ;;  %93 = vst [vmem:[#allocation3] sm:$0x1] %v1613_v12 }
  0x57   :  { %711 = vmatprep.mubr.bf16.mxu1 %v1156_v37  ;;  %v1436_v41 = vld [vmem:[#allocation8 + $0x180] sm:$0xff]   ;;  %v1439_v44 = vld [vmem:[#allocation8 + $0x108] sm:$0xff]   ;;  %v1443_v48 = vld [vmem:[#allocation8 + $0x110] sm:$0xff]   ;;  %94 = vst [vmem:[#allocation4] sm:$0x1] %v1613_v12 }
  0x58   :  { %1249 = vmatpush3.bf16.msra.mxu0 %v1411_v14  ;;  %v1440_v45 = vld [vmem:[#allocation8 + $0x188] sm:$0xff]   ;;  %v1444_v49 = vld [vmem:[#allocation8 + $0x190] sm:$0xff]   ;;  %v1445_v50 = vld [vmem:[#allocation8 + $0x158] sm:$0xff]  }
  0x59   :  { %1271 = vmatpush3.bf16.msra.mxu1 %v1412_v15  ;;  %1250 = vmatprep.subr.bf16.mxu0 %v1413_v16  ;;  %v1446_v51 = vld [vmem:[#allocation8 + $0x1d8] sm:$0xff]   ;;  %v1449_v54 = vld [vmem:[#allocation8 + $0x160] sm:$0xff]   ;;  %v1453_v58 = vld [vmem:[#allocation8 + $0x168] sm:$0xff]  }
  0x5a   :  { %1272 = vmatprep.subr.bf16.mxu1 %v1414_v17  ;;  %v1447_v52 = vld [vmem:[#allocation8 + $0x118] sm:$0xff]   ;;  %v1450_v55 = vld [vmem:[#allocation8 + $0x1e0] sm:$0xff]   ;;  %v1454_v59 = vld [vmem:[#allocation8 + $0x1e8] sm:$0xff]  }
  0x5b   :  { %v1448_v53 = vld [vmem:[#allocation8 + $0x198] sm:$0xff]   ;;  %v1451_v56 = vld [vmem:[#allocation8 + $0x120] sm:$0xff]   ;;  %v1455_v60 = vld [vmem:[#allocation8 + $0x128] sm:$0xff]  }
  0x5c   :  { %1251 = vmatpush3.bf16.msra.mxu0 %v1415_v18  ;;  %v1452_v57 = vld [vmem:[#allocation8 + $0x1a0] sm:$0xff]   ;;  %v1456_v61 = vld [vmem:[#allocation8 + $0x1a8] sm:$0xff]   ;;  %v1457_v62 = vld [vmem:[#allocation8 + $0x170] sm:$0xff]  }
  0x5d   :  { %1273 = vmatpush3.bf16.msra.mxu1 %v1416_v19  ;;  %1252 = vmatprep.subr.bf16.mxu0 %v1417_v20  ;;  %v1458_v63 = vld [vmem:[#allocation8 + $0x1f0] sm:$0xff]   ;;  %v1461_v2 = vld [vmem:[#allocation8 + $0x178] sm:$0xff]   ;;  %v1469_v13 = vld [vmem:[#allocation10] sm:$0xff]  }
  0x5e   :  { %1274 = vmatprep.subr.bf16.mxu1 %v1418_v21  ;;  %v1459_v0 = vld [vmem:[#allocation8 + $0x130] sm:$0xff]   ;;  %v1462_v3 = vld [vmem:[#allocation8 + $0x1f8] sm:$0xff]   ;;  %v1470_v14 = vld [vmem:[#allocation10 + $0x8] sm:$0xff]  }
  0x5f   :  { %v1460_v1 = vld [vmem:[#allocation8 + $0x1b0] sm:$0xff]   ;;  %v1463_v4 = vld [vmem:[#allocation8 + $0x138] sm:$0xff]   ;;  %v1473_v17 = vld [vmem:[#allocation10 + $0x20] sm:$0xff]  }
  0x60   :  { %1253 = vmatpush3.bf16.msra.mxu0 %v1419_v22  ;;  %v1464_v5 = vld [vmem:[#allocation8 + $0x1b8] sm:$0xff]   ;;  %v97_v6 = vld [vmem:[#allocation5 + $0x10] sm:$0xff]  ;;  %v1474_v18 = vld [vmem:[#allocation10 + $0x28] sm:$0xff]  }
  0x61   :  { %1275 = vmatpush3.bf16.msra.mxu1 %v1420_v23  ;;  %1254 = vmatprep.subr.bf16.mxu0 %v1421_v24  ;;  %v1157_v7 = vcombine.low %v97_v6, %v97_v6  ;;  %v1158_v8 = vcombine.high %v97_v6, %v97_v6  ;;  %v98_v9 = vld [vmem:[#allocation5 + $0x18] sm:$0xff]  ;;  %v1471_v15 = vld [vmem:[#allocation10 + $0x10] sm:$0xff]  }
  0x62   :  { %1276 = vmatprep.subr.bf16.mxu1 %v1422_v25  ;;  %v1159_v10 = vcombine.low %v98_v9, %v98_v9  ;;  %v1160_v11 = vcombine.high %v98_v9, %v98_v9  ;;  %v1472_v16 = vld [vmem:[#allocation10 + $0x18] sm:$0xff]   ;;  %v1475_v19 = vld [vmem:[#allocation10 + $0x30] sm:$0xff]  }
  0x63   :  { %v1476_v20 = vld [vmem:[#allocation10 + $0x38] sm:$0xff]  }
  0x64   :  { %1255 = vmatpush3.bf16.msra.mxu0 %v1423_v26 }
  0x65   :  { %1277 = vmatpush3.bf16.msra.mxu1 %v1424_v27  ;;  %1256 = vmatprep.subr.bf16.mxu0 %v1425_v28 }
  0x66   :  { %1278 = vmatprep.subr.bf16.mxu1 %v1426_v29 }
  0x68   :  { %1257 = vmatpush3.bf16.msra.mxu0 %v1427_v30 }
  0x69   :  { %1279 = vmatpush3.bf16.msra.mxu1 %v1428_v31  ;;  %1286 = vmatprep.subr.bf16.mxu0 %v1433_v38 }
  0x6a   :  { %1308 = vmatprep.subr.bf16.mxu1 %v1434_v39 }
  0x6b   :  { %672 = vmatmul.mubr.bf16.vlgmr.msra.gmra.mrb[0].mxu0 %v1153_v34 }
  0x6c   :  { %712 = vmatmul.mubr.bf16.vlgmr.msra.gmra.mrb[0].mxu1 %v1155_v36  ;;  %1287 = vmatpush3.bf16.msra.mxu0 %v1435_v40 }
  0x6d   :  { %1309 = vmatpush3.bf16.msra.mxu1 %v1436_v41  ;;  %1288 = vmatprep.subr.bf16.mxu0 %v1437_v42 }
  0x6e   :  { %1310 = vmatprep.subr.bf16.mxu1 %v1438_v43  ;;  %751 = vmatprep.mubr.bf16.mxu0 %v1158_v8 }
  0x6f   :  { %791 = vmatprep.mubr.bf16.mxu1 %v1160_v11  ;;  %v843_v11 = vld [vmem:[%s1779_s3] sm:$0x1] }
  0x70   :  { %1289 = vmatpush3.bf16.msra.mxu0 %v1439_v44 }
  0x71   :  { %1311 = vmatpush3.bf16.msra.mxu1 %v1440_v45  ;;  %1290 = vmatprep.subr.bf16.mxu0 %v1441_v46 }
  0x72   :  { %1312 = vmatprep.subr.bf16.mxu1 %v1442_v47 }
  0x74   :  { %1291 = vmatpush3.bf16.msra.mxu0 %v1443_v48 }
  0x75   :  { %1313 = vmatpush3.bf16.msra.mxu1 %v1444_v49  ;;  %1292 = vmatprep.subr.bf16.mxu0 %v1445_v50 }
  0x76   :  { %1314 = vmatprep.subr.bf16.mxu1 %v1446_v51 }
  0x78   :  { %1293 = vmatpush3.bf16.msra.mxu0 %v1447_v52 }
  0x79   :  { %1315 = vmatpush3.bf16.msra.mxu1 %v1448_v53  ;;  %1294 = vmatprep.subr.bf16.mxu0 %v1449_v54  ;;  %v818_v54 = vld [vmem:[#allocation3] sm:$0x1] }
  0x7a   :  { %1316 = vmatprep.subr.bf16.mxu1 %v1450_v55 }
  0x7c   :  { %1295 = vmatpush3.bf16.msra.mxu0 %v1451_v56 }
  0x7d   :  { %1317 = vmatpush3.bf16.msra.mxu1 %v1452_v57  ;;  %1296 = vmatprep.subr.bf16.mxu0 %v1453_v58  ;;  %v827_v57 = vld [vmem:[#allocation4] sm:$0x1] }
  0x7e   :  { %1318 = vmatprep.subr.bf16.mxu1 %v1454_v59 }
  0x80   :  { %1297 = vmatpush3.bf16.msra.mxu0 %v1455_v60 }
  0x81   :  { %1319 = vmatpush3.bf16.msra.mxu1 %v1456_v61  ;;  %1298 = vmatprep.subr.bf16.mxu0 %v1457_v62 }
  0x82   :  { %1320 = vmatprep.subr.bf16.mxu1 %v1458_v63 }
  0x84   :  { %1299 = vmatpush3.bf16.msra.mxu0 %v1459_v0 }
  0x85   :  { %1321 = vmatpush3.bf16.msra.mxu1 %v1460_v1  ;;  %1300 = vmatprep.subr.bf16.mxu0 %v1461_v2 }
  0x86   :  { %1322 = vmatprep.subr.bf16.mxu1 %v1462_v3 }
  0x88   :  { %1301 = vmatpush3.bf16.msra.mxu0 %v1463_v4 }
  0x89   :  { %1323 = vmatpush3.bf16.msra.mxu1 %v1464_v5  ;;  %1348 = vmatprep.subr.bf16.mxu0 %v1613_v12  ;;  %v839_v5 = vlaneseq }
  0x8a   :  { %1368 = vmatprep.subr.bf16.mxu1 %v1613_v12 }
  0x8b   :  { %752 = vmatmul.mubr.bf16.vlgmr.msra.gmra.mrb[4].mxu0 %v1157_v7  ;;  %v840_v6 = vshrl.u32 %v839_v5, 7  ;;  %v842_v7 = vld [vmem:[%s1778_s2] sm:$0x1] }
  0x8c   :  { %792 = vmatmul.mubr.bf16.vlgmr.msra.gmra.mrb[4].mxu1 %v1159_v10  ;;  %1349 = vmatpush3.bf16.msra.mxu0 %v1469_v13 }
  0x8d   :  { %1350 = vmatprep.subr.bf16.mxu0 %v1613_v12  ;;  %1364 = vmatprep.mubr.msk.bf16.mxu0 %vm1614_vm0, %v1613_v12  ;;  %v1739_v8 = vsub.s32 0, %v840_v6  ;;  %vm841_vm2 = vcmp.lt.s32.totalorder %v840_v6, 2 }
  0x8e   :  { %1384 = vmatprep.mubr.msk.bf16.mxu1 %vm1614_vm0, %v1613_v12 }
  0x90   :  { %1351 = vmatpush3.bf16.msra.mxu0 %v1470_v14 }
  0x91   :  { %1352 = vmatprep.subr.bf16.mxu0 %v1613_v12 }
  0x94   :  { %1353 = vmatpush3.bf16.msra.mxu0 %v1471_v15 }
  0x95   :  { %1354 = vmatprep.subr.bf16.mxu0 %v1613_v12 }
  0x98   :  { %1355 = vmatpush3.bf16.msra.mxu0 %v1472_v16 }
  0x99   :  { %1356 = vmatprep.subr.bf16.mxu0 %v1613_v12 }
  0x9c   :  { %1357 = vmatpush3.bf16.msra.mxu0 %v1473_v17 }
  0x9d   :  { %1358 = vmatprep.subr.bf16.mxu0 %v1613_v12 }
  0xa0   :  { %1359 = vmatpush3.bf16.msra.mxu0 %v1474_v18 }
  0xa1   :  { %1360 = vmatprep.subr.bf16.mxu0 %v1613_v12 }
  0xa4   :  { %1361 = vmatpush3.bf16.msra.mxu0 %v1475_v19 }
  0xa5   :  { %1362 = vmatprep.subr.bf16.mxu0 %v1613_v12 }
  0xa8   :  { %1363 = vmatpush3.bf16.msra.mxu0 %v1476_v20 }
 0x13e   :  { %v1258_v21 = vpop.f32.mrb[0].mxu0 }
 0x13f   :  { %v1280_v22 = vpop.f32.mrb[0].mxu1  ;;  %v1259_v23 = vpop.f32.mrb[1].mxu0 }
 0x140   :  { %v1281_v24 = vpop.f32.mrb[1].mxu1  ;;  %v1260_v25 = vadd.f32 %v1259_v23, %v1258_v21  ;;  %v1261_v27 = vpop.f32.mrb[2].mxu0  ;;  %v1478_v23 = vld [vmem:[#allocation11 + $0x8] sm:$0xff]  }
 0x141   :  { %v1282_v26 = vadd.f32 %v1281_v24, %v1280_v22  ;;  %v1283_v28 = vpop.f32.mrb[2].mxu1  ;;  %v1262_v29 = vpop.f32.mrb[3].mxu0  ;;  %v1477_v22 = vld [vmem:[#allocation11] sm:$0xff]   ;;  %v1479_v24 = vld [vmem:[#allocation11 + $0x10] sm:$0xff]   ;;  %v1482_v27 = vld [vmem:[#allocation11 + $0x28] sm:$0xff]  }
 0x142   :  { %v1284_v30 = vpop.f32.mrb[3].mxu1  ;;  %1369 = vmatpush3.bf16.msra.mxu1 %v1477_v22  ;;  %v1483_v28 = vld [vmem:[#allocation11 + $0x30] sm:$0xff]   ;;  %v1484_v29 = vld [vmem:[#allocation11 + $0x38] sm:$0xff]  }
 0x143   :  { %v714_v31 = vadd.f32 %v1282_v26, %v1260_v25  ;;  %1370 = vmatprep.subr.bf16.mxu1 %v1613_v12  ;;  %v1480_v25 = vld [vmem:[#allocation11 + $0x18] sm:$0xff]   ;;  %v1481_v26 = vld [vmem:[#allocation11 + $0x20] sm:$0xff]  }
 0x146   :  { %1371 = vmatpush3.bf16.msra.mxu1 %v1478_v23 }
 0x147   :  { %1372 = vmatprep.subr.bf16.mxu1 %v1613_v12 }
 0x14a   :  { %1373 = vmatpush3.bf16.msra.mxu1 %v1479_v24 }
 0x14b   :  { %1374 = vmatprep.subr.bf16.mxu1 %v1613_v12 }
 0x14e   :  { %1375 = vmatpush3.bf16.msra.mxu1 %v1480_v25 }
 0x14f   :  { %1376 = vmatprep.subr.bf16.mxu1 %v1613_v12 }
 0x152   :  { %1377 = vmatpush3.bf16.msra.mxu1 %v1481_v26 }
 0x153   :  { %1378 = vmatprep.subr.bf16.mxu1 %v1613_v12 }
 0x156   :  { %1379 = vmatpush3.bf16.msra.mxu1 %v1482_v27 }
 0x157   :  { %1380 = vmatprep.subr.bf16.mxu1 %v1613_v12 }
 0x15a   :  { %1381 = vmatpush3.bf16.msra.mxu1 %v1483_v28 }
 0x15b   :  { %1382 = vmatprep.subr.bf16.mxu1 %v1613_v12 }
 0x15e   :  { %v1302_v32 = vpop.f32.mrb[4].mxu0  ;;  %1383 = vmatpush3.bf16.msra.mxu1 %v1484_v29 }
 0x15f   :  { %v1324_v33 = vpop.f32.mrb[4].mxu1  ;;  %v1303_v34 = vpop.f32.mrb[5].mxu0 }
 0x160   :  { %v1325_v35 = vpop.f32.mrb[5].mxu1  ;;  %v1304_v36 = vadd.f32 %v1303_v34, %v1302_v32  ;;  %v1305_v38 = vpop.f32.mrb[6].mxu0 }
 0x161   :  { %v1326_v37 = vadd.f32 %v1325_v35, %v1324_v33  ;;  %v1327_v39 = vpop.f32.mrb[6].mxu1  ;;  %v1306_v40 = vpop.f32.mrb[7].mxu0 }
 0x162   :  { %v1328_v41 = vpop.f32.mrb[7].mxu1  ;;  %v754_v42 = vadd.f32 %v1304_v36, %v714_v31 }
 0x164   :  { %v794_v43 = vadd.f32 %v1326_v37, %v754_v42 }
 0x166   :  { %v819_v44 = vrot.slane %v794_v43, 4  ;;  %v828_v45 = vmul.f32 %v794_v43, %v794_v43 }
 0x168   :  { %v820_v46 = vadd.f32 %v819_v44, %v794_v43  ;;  %v829_v47 = vrot.slane %v828_v45, 4 }
 0x16a   :  { %v821_v48 = vrot.slane %v820_v46, 2  ;;  %v830_v49 = vadd.f32 %v829_v47, %v828_v45 }
 0x16c   :  { %v822_v50 = vadd.f32 %v821_v48, %v820_v46  ;;  %v831_v51 = vrot.slane %v830_v49, 2 }
 0x16e   :  { %v823_v52 = vrot.slane %v822_v50, 1  ;;  %v832_v53 = vadd.f32 %v831_v51, %v830_v49 }
 0x170   :  { %v824_v55 = vadd.f32 %v823_v52, %v822_v50  ;;  %v833_v56 = vrot.slane %v832_v53, 1  ;;  %v890_v52 = vld [vmem:[%s1781_s5] sm:$0x1] }
 0x172   :  { %v825_v58 = vadd.f32 %v824_v55, %v818_v54  ;;  %v834_v59 = vadd.f32 %v833_v56, %v832_v53  ;;  %v891_v55 = vld [vmem:[%s1782_s6] sm:$0x1]  ;;  %s1577_s6 = scalar_lea.vmem %s1143_s22, 128 }
 0x173   :  { %p1578_p4 = scmp.ne.s32.totalorder %s1143_s22, %s1577_s6  ;;  %p1583_p6 = scmp.lt.s32.totalorder %s1577_s6, %s1577_s6 }
 0x174   :  { %826 = vst [vmem:[#allocation3] sm:$0x1] %v825_v58  ;;  %v835_v60 = vadd.f32 %v834_v59, %v827_v57 }
 0x175   :  { %p1584_p7 = por %p1583_p6, %p1582_p5 }
 0x176   :  { %836 = vst [vmem:[#allocation4] sm:$0x1] %v835_v60 }
 0x177   :  { %p1585_p8 = pnand %p1584_p7, %p1578_p4 }
 0x17b   :  { %v844_v61 = vld [vmem:[#allocation3] sm:$0x1] }
 0x17c   :  { %v845_v62 = vmul.f32 0.5, %v844_v61 }
 0x17d   :  { %v846_v63 = vld [vmem:[#allocation4] sm:$0x1] }
 0x17e   :  { %v847_v0 = vmul.f32 0.5, %v846_v63  ;;  %v848_v1 = vmul.f32 %v845_v62, %v845_v62 }
 0x180   :  { %v849_v2 = vsub.f32 %v847_v0, %v848_v1  ;;  %v1233_v1 = vld [vmem:[%s1784_s8] ss:$0 sm:$0xff] }
 0x182   :  { %v850_v3 = vmax.f32 %v849_v2, 0.0 }
 0x184   :  { %v851_v4 = vadd.f32 1e-05, %v850_v3 }
 0x186   :  { %1485 = vrsqrt.f32 %v851_v4 }
 0x190   :  { %v1486_v9 = vpop.eup %1485 }
 0x191   :  { %v853_v10 = vmul.f32 %v1486_v9, %v842_v7 }
 0x193   :  { %v854_v13 = vmul.f32 %v853_v10, %v845_v62  ;;  %v861_v14 = vrot.slane %v853_v10, %v1739_v8 }
 0x195   :  { %v855_v15 = vsub.f32 %v843_v11, %v854_v13  ;;  %v863_v16 = vmul.f32 %v861_v14, %v794_v43 }
 0x197   :  { %v868_v17 = vrot.slane %v855_v15, %v1739_v8 }
 0x199   :  { %v870_v18 = vadd.f32 %v868_v17, %v863_v16 }
 0x19b   :  { %vm871_vm1 = vcmp.ge.f32.partialorder %v870_v18, 0.0  ;;  %v872_v19 = vmul.f32 0.01, %v870_v18 }
 0x19d   :  { %v873_v20 = vsel %vm871_vm1, %v870_v18, %v872_v19 }
 0x19e   :  { %v892_v21 = vpack.c.bf16 %v873_v20, %v873_v20 }
 0x1a0   :  { %1365 = vmatmul.mubr.bf16.vlgmr.msra.gmra.mrb[8].mxu0 %v892_v21 }
 0x273   :  { %v975_v30 = vpop.f32.mrb[8].mxu0 }
 0x274   :  { %v983_v31 = vsel %vm841_vm2, %v975_v30, 0.0  ;;  %v1366_v32 = vpop.f32.mrb[9].mxu0 }
 0x275   :  { %v984_v33 = vrot.slane %v983_v31, 4  ;;  %v978_v34 = vpop.f32.mrb[10].mxu0 }
 0x276   :  { %v1367_v35 = vpop.f32.mrb[11].mxu0 }
 0x277   :  { %v985_v36 = vadd.f32 %v984_v33, %v983_v31 }
 0x279   :  { %v986_v37 = vrot.slane %v985_v36, 2 }
 0x27b   :  { %v987_v38 = vadd.f32 %v986_v37, %v985_v36 }
 0x27d   :  { %v988_v39 = vrot.slane %v987_v38, 1 }
 0x27f   :  { %v989_v40 = vadd.f32 %v988_v39, %v987_v38 }
 0x281   :  { %v990_v41 = vmul.f32 0.5, %v989_v40 }
 0x283   :  { %v991_v42 = vsub.f32 %v975_v30, %v990_v41 }
 0x285   :  { %v992_v43 = vsel %vm841_vm2, %v991_v42, 0.0 }
 0x286   :  { %v993_v44 = vmul.f32 %v992_v43, %v992_v43 }
 0x288   :  { %v994_v45 = vrot.slane %v993_v44, 4 }
 0x28a   :  { %v995_v12 = vadd.f32 %v994_v45, %v993_v44 }
 0x28c   :  { %v996_v46 = vrot.slane %v995_v12, 2 }
 0x28e   :  { %v997_v47 = vadd.f32 %v996_v46, %v995_v12 }
 0x290   :  { %v998_v48 = vrot.slane %v997_v47, 1 }
 0x292   :  { %v999_v49 = vadd.f32 %v998_v48, %v997_v47 }
 0x294   :  { %v1000_v50 = vmul.f32 0.5, %v999_v49 }
 0x296   :  { %v1001_v51 = vadd.f32 1e-05, %v1000_v50 }
 0x298   :  { %1487 = vrsqrt.f32 %v1001_v51 }
 0x2a2   :  { %v1488_v53 = vpop.eup %1487 }
 0x2a3   :  { %v1003_v54 = vmul.f32 %v1488_v53, %v890_v52 }
 0x2a5   :  { %v1004_v56 = vmul.f32 %v1003_v54, %v990_v41  ;;  %v1010_v57 = vrot.slane %v1003_v54, %v1739_v8 }
 0x2a7   :  { %v1005_v58 = vsub.f32 %v891_v55, %v1004_v56  ;;  %v1012_v59 = vmul.f32 %v1010_v57, %v975_v30 }
 0x2a9   :  { %v1017_v60 = vrot.slane %v1005_v58, %v1739_v8 }
 0x2ab   :  { %v1019_v61 = vadd.f32 %v1017_v60, %v1012_v59 }
 0x2ad   :  { %v1021_v62 = vmul.f32 0.01, %v1019_v61  ;;  %vm1020_vm3 = vcmp.ge.f32.partialorder %v1019_v61, 0.0 }
 0x2af   :  { %v1022_v63 = vsel %vm1020_vm3, %v1019_v61, %v1021_v62 }
 0x2b0   :  { %v1040_v0 = vpack.c.bf16 %v1022_v63, %v1022_v63 }
 0x2b2   :  { %1385 = vmatmul.mubr.bf16.vlgmr.msra.gmra.mrb[8].mxu1 %v1040_v0 }
 0x385   :  { %v1129_v2 = vpop.f32.mrb[8].mxu1 }
 0x386   :  { %v1130_v3 = vadd.f32 %v1233_v1, %v1129_v2  ;;  %v1386_v4 = vpop.f32.mrb[9].mxu1 }
 0x387   :  { %v1132_v5 = vpop.f32.mrb[10].mxu1 }
 0x388   :  { %1135 = vst [vmem:[#allocation13] sm:$0xff] %v1130_v3  ;;  %v1387_v6 = vpop.f32.mrb[11].mxu1 }
 0x389   :  { %1588 = shalt.err (!%p1585_p8)
}
 0x38a   :  { %s1589_s8 = scalar_lea.hbm %s1785_s9, 128 }
 0x38b   :  { %p1590_p9 = scmp.ne.s32.totalorder %s1785_s9, %s1589_s8  ;;  %p1593_p10 = scmp.lt.u32.totalorder %s1589_s8, %s1785_s9 }
 0x38d   :  { %p1595_p11 = pnand %p1593_p10, %p1590_p9 }
 0x38f   :  { %1598 = shalt.err (!%p1595_p11)
}
 0x390   :  { %1145 = dma.vmem_to_hbm [thread:$0]  %s1143_s22, 128, %s1785_s9, [#allocation7]  }
 0x391   :  { %1605 = dma.done.wait [#allocation7], 128  }
 0x392   :  { %1606 = vsyncadd [#allocation7], 4294967168 }
 0x393   :  { %1149 = vsyncpa [#allocation6], 1 }
 0x394   :  { %1150 = vsyncpa [#allocation9], 1 }
 0x395   :  { %1151 = vsyncpa [#allocation12], 1 }
 0x396   :  { %1152 = vsyncpa [#allocation7], 1 }

// kernel: tpu_custom_call.1
= control target key start
LH: loop header
LB: loop body
LE: loop exit
PB: predicated region body
PF: predicated region fallthrough
CT: control target
= control target key end

     0   :  { %14 = vsyncpa [#allocation6], 0  ;;  %s1776_s0 = inlined_call_operand.hbm [shape: bf16[8,1024], index: 0, kind: input, shape index: {}]   ;;  %s1777_s1 = inlined_call_operand.hbm [shape: bf16[1024,128], index: 1, kind: input, shape index: {}]   ;;  %s1778_s2 = inlined_call_operand.vmem [shape: f32[1,128], index: 2, kind: input, shape index: {}]   ;;  %s1779_s3 = inlined_call_operand.vmem [shape: f32[1,128], index: 3, kind: input, shape index: {}]   ;;  %s1780_s4 = inlined_call_operand.hbm [shape: bf16[128,128], index: 4, kind: input, shape index: {}]   ;;  %s1781_s5 = inlined_call_operand.vmem [shape: f32[1,128], index: 5, kind: input, shape index: {}]   ;;  %s1782_s6 = inlined_call_operand.vmem [shape: f32[1,128], index: 6, kind: input, shape index: {}]   ;;  %s1783_s7 = inlined_call_operand.hbm [shape: bf16[128,128], index: 7, kind: input, shape index: {}]   ;;  %s1784_s8 = inlined_call_operand.vmem [shape: f32[1,128], index: 8, kind: input, shape index: {}]   ;;  %s1785_s9 = inlined_call_operand.hbm [shape: f32[8,128], index: 9, kind: output, shape index: {}]  }
   0x1   :  { %15 = vsyncpa [#allocation9], 0 }
   0x2   :  { %16 = vsyncpa [#allocation12], 0 }
   0x3   :  { %17 = vsyncpa [#allocation7], 0  ;;  %s1607_s30 = smov [#allocation8]   ;;  %s1489_s13 = scalar_lea.hbm %s1777_s1, 8192 }
   0x4   :  { %s33_s10 = sshll.u32 %s1607_s30, 4  ;;  %p1490_p0 = scmp.ne.s32.totalorder %s1777_s1, %s1489_s13  ;;  %s34_s10 = int_to_ptr.vmem [resolvable:$true] %s33_s10 }
   0x5   :  { %p1493_p1 = scmp.lt.u32.totalorder %s1489_s13, %s1777_s1 }
   0x7   :  { %p1495_p2 = pnand %p1493_p1, %p1490_p0 }
   0x9   :  { %1498 = shalt.err (!%p1495_p2)
}
   0xa   :  { %s1499_s18 = scalar_lea.vmem %s34_s10, 8192  ;;  %p1504_p4 = scmp.lt.s32.totalorder %s34_s10, %s34_s10 }
   0xb   :  { %p1500_p3 = scmp.ne.s32.totalorder %s34_s10, %s1499_s18  ;;  %p1505_p5 = scmp.lt.s32.totalorder %s1499_s18, %s1499_s18 }
   0xd   :  { %p1506_p6 = por %p1505_p5, %p1504_p4 }
   0xf   :  { %p1507_p7 = pnand %p1506_p6, %p1500_p3 }
  0x11   :  { %1510 = shalt.err (!%p1507_p7)
}
  0x12   :  { %s1608_s19 = smov 64   ;;  %s1609_s20 = smov 4  }
  0x13   :  { %39 = dma.hbm_to_vmem [thread:$0]  %s1777_s1, 8192, %s34_s10, [#allocation9], %s1608_s19, %s1608_s19, %s1609_s20  }
  0x14   :  { %s1610_s23 = smov [#allocation5]   ;;  %s1611_s25 = smov [#allocation10]  }
  0x15   :  { %s24_s24 = sshll.u32 %s1610_s23, 4  ;;  %s49_s26 = sshll.u32 %s1611_s25, 4  ;;  %s25_s24 = int_to_ptr.vmem [resolvable:$true] %s24_s24  ;;  %s50_s26 = int_to_ptr.vmem [resolvable:$true] %s49_s26 }
  0x16   :  { %s1511_s29 = scalar_lea.hbm %s1776_s0, 512 }
  0x17   :  { %p1512_p8 = scmp.ne.s32.totalorder %s1776_s0, %s1511_s29  ;;  %p1515_p9 = scmp.lt.u32.totalorder %s1511_s29, %s1776_s0 }
  0x19   :  { %p1517_p10 = pnand %p1515_p9, %p1512_p8 }
  0x1b   :  { %1520 = shalt.err (!%p1517_p10)
}
  0x1c   :  { %s1521_s1 = scalar_lea.vmem %s25_s24, 512  ;;  %p1526_p12 = scmp.lt.s32.totalorder %s25_s24, %s25_s24 }
  0x1d   :  { %p1522_p11 = scmp.ne.s32.totalorder %s25_s24, %s1521_s1  ;;  %p1527_p13 = scmp.lt.s32.totalorder %s1521_s1, %s1521_s1 }
  0x1f   :  { %p1528_p0 = por %p1527_p13, %p1526_p12 }
  0x21   :  { %p1529_p1 = pnand %p1528_p0, %p1522_p11 }
  0x23   :  { %1532 = shalt.err (!%p1529_p1)
}
  0x24   :  { %27 = dma.hbm_to_vmem [thread:$0]  %s1776_s0, 512, %s25_s24, [#allocation6]  }
  0x25   :  { %s1533_s17 = scalar_lea.hbm %s1780_s4, 1024 }
  0x26   :  { %p1534_p2 = scmp.ne.s32.totalorder %s1780_s4, %s1533_s17  ;;  %p1537_p3 = scmp.lt.u32.totalorder %s1533_s17, %s1780_s4 }
  0x28   :  { %p1539_p4 = pnand %p1537_p3, %p1534_p2 }
  0x2a   :  { %1542 = shalt.err (!%p1539_p4)
}
  0x2b   :  { %s1543_s25 = scalar_lea.vmem %s50_s26, 1024  ;;  %p1548_p6 = scmp.lt.s32.totalorder %s50_s26, %s50_s26 }
  0x2c   :  { %p1544_p5 = scmp.ne.s32.totalorder %s50_s26, %s1543_s25  ;;  %p1549_p7 = scmp.lt.s32.totalorder %s1543_s25, %s1543_s25 }
  0x2e   :  { %p1550_p8 = por %p1549_p7, %p1548_p6 }
  0x30   :  { %p1551_p9 = pnand %p1550_p8, %p1544_p5 }
  0x32   :  { %1554 = shalt.err (!%p1551_p9)
}
  0x33   :  { %55 = dma.hbm_to_vmem [thread:$0]  %s1780_s4, 1024, %s50_s26, [#allocation9], %s1608_s19, %s1608_s19, %s1609_s20  }
  0x34   :  { %s1612_s27 = smov [#allocation11]   ;;  %s1555_s11 = scalar_lea.hbm %s1783_s7, 1024 }
  0x35   :  { %s65_s28 = sshll.u32 %s1612_s27, 4  ;;  %p1556_p10 = scmp.ne.s32.totalorder %s1783_s7, %s1555_s11  ;;  %s66_s28 = int_to_ptr.vmem [resolvable:$true] %s65_s28 }
  0x36   :  { %p1559_p11 = scmp.lt.u32.totalorder %s1555_s11, %s1783_s7 }
  0x38   :  { %p1561_p12 = pnand %p1559_p11, %p1556_p10 }
  0x3a   :  { %1564 = shalt.err (!%p1561_p12)
}
  0x3b   :  { %s1565_s14 = scalar_lea.vmem %s66_s28, 1024  ;;  %p1570_p0 = scmp.lt.s32.totalorder %s66_s28, %s66_s28 }
  0x3c   :  { %p1566_p13 = scmp.ne.s32.totalorder %s66_s28, %s1565_s14  ;;  %p1571_p1 = scmp.lt.s32.totalorder %s1565_s14, %s1565_s14 }
  0x3e   :  { %p1572_p2 = por %p1571_p1, %p1570_p0 }
  0x40   :  { %p1573_p3 = pnand %p1572_p2, %p1566_p13 }
  0x42   :  { %1576 = shalt.err (!%p1573_p3)
}
  0x43   :  { %71 = dma.hbm_to_vmem [thread:$0]  %s1783_s7, 1024, %s66_s28, [#allocation12], %s1608_s19, %s1608_s19, %s1609_s20  }
  0x44   :  { %1599 = dma.done.wait [#allocation6], 512  }
  0x45   :  { %1600 = vsyncadd [#allocation6], 4294966784 }
  0x46   :  { %1601 = dma.done.wait [#allocation9], 9216  }
  0x47   :  { %1602 = vsyncadd [#allocation9], 4294958080 }
  0x48   :  { %1603 = dma.done.wait [#allocation12], 1024  }
  0x49   :  { %1604 = vsyncadd [#allocation12], 4294966272  ;;  %v1397_v0 = vld [vmem:[#allocation8 + $0x40] sm:$0xff]   ;;  %v1401_v4 = vld [vmem:[#allocation8 + $0x48] sm:$0xff]   ;;  %vm1614_vm0 = vmmov 0   ;;  %s1615_s21 = smov [#allocation13]  }
  0x4a   :  { %v1398_v1 = vld [vmem:[#allocation8 + $0xc0] sm:$0xff]   ;;  %1242 = vmatprep.subr.bf16.mxu0 %v1397_v0  ;;  %v1402_v5 = vld [vmem:[#allocation8 + $0xc8] sm:$0xff]   ;;  %v1405_v8 = vld [vmem:[#allocation8 + $0x50] sm:$0xff]   ;;  %s1142_s22 = sshll.u32 %s1615_s21, 4  ;;  %s1143_s22 = int_to_ptr.vmem [resolvable:$true] %s1142_s22 }
  0x4b   :  { %v1399_v2 = vld [vmem:[#allocation8] sm:$0xff]   ;;  %1264 = vmatprep.subr.bf16.mxu1 %v1398_v1  ;;  %v1403_v6 = vld [vmem:[#allocation8 + $0x8] sm:$0xff]   ;;  %v1406_v9 = vld [vmem:[#allocation8 + $0xd0] sm:$0xff]   ;;  %p1582_p5 = scmp.lt.s32.totalorder %s1143_s22, %s1143_s22 }
  0x4c   :  { %v1400_v3 = vld [vmem:[#allocation8 + $0x80] sm:$0xff]   ;;  %1243 = vmatpush3.bf16.msra.mxu0 %v1399_v2  ;;  %v1404_v7 = vld [vmem:[#allocation8 + $0x88] sm:$0xff]   ;;  %v1407_v10 = vld [vmem:[#allocation8 + $0x10] sm:$0xff]  }
  0x4d   :  { %1265 = vmatpush3.bf16.msra.mxu1 %v1400_v3  ;;  %1244 = vmatprep.subr.bf16.mxu0 %v1401_v4  ;;  %v1408_v11 = vld [vmem:[#allocation8 + $0x90] sm:$0xff]   ;;  %v1409_v12 = vld [vmem:[#allocation8 + $0x58] sm:$0xff]   ;;  %v1413_v16 = vld [vmem:[#allocation8 + $0x60] sm:$0xff]  }
  0x4e   :  { %1266 = vmatprep.subr.bf16.mxu1 %v1402_v5  ;;  %v1410_v13 = vld [vmem:[#allocation8 + $0xd8] sm:$0xff]   ;;  %v1414_v17 = vld [vmem:[#allocation8 + $0xe0] sm:$0xff]   ;;  %v1417_v20 = vld [vmem:[#allocation8 + $0x68] sm:$0xff]  }
  0x4f   :  { %v1411_v14 = vld [vmem:[#allocation8 + $0x18] sm:$0xff]   ;;  %v1415_v18 = vld [vmem:[#allocation8 + $0x20] sm:$0xff]   ;;  %v1418_v21 = vld [vmem:[#allocation8 + $0xe8] sm:$0xff]  }
  0x50   :  { %1245 = vmatpush3.bf16.msra.mxu0 %v1403_v6  ;;  %v1412_v15 = vld [vmem:[#allocation8 + $0x98] sm:$0xff]   ;;  %v1416_v19 = vld [vmem:[#allocation8 + $0xa0] sm:$0xff]   ;;  %v1419_v22 = vld [vmem:[#allocation8 + $0x28] sm:$0xff]  }
  0x51   :  { %1267 = vmatpush3.bf16.msra.mxu1 %v1404_v7  ;;  %1246 = vmatprep.subr.bf16.mxu0 %v1405_v8  ;;  %v1420_v23 = vld [vmem:[#allocation8 + $0xa8] sm:$0xff]   ;;  %v1421_v24 = vld [vmem:[#allocation8 + $0x70] sm:$0xff]   ;;  %v1425_v28 = vld [vmem:[#allocation8 + $0x78] sm:$0xff]  }
  0x52   :  { %1268 = vmatprep.subr.bf16.mxu1 %v1406_v9  ;;  %v1422_v25 = vld [vmem:[#allocation8 + $0xf0] sm:$0xff]   ;;  %v1426_v29 = vld [vmem:[#allocation8 + $0xf8] sm:$0xff]   ;;  %v95_v32 = vld [vmem:[#allocation5] sm:$0xff] }
  0x53   :  { %v1423_v26 = vld [vmem:[#allocation8 + $0x30] sm:$0xff]   ;;  %v1427_v30 = vld [vmem:[#allocation8 + $0x38] sm:$0xff]   ;;  %v96_v33 = vld [vmem:[#allocation5 + $0x8] sm:$0xff]  ;;  %v1153_v34 = vcombine.low %v95_v32, %v95_v32  ;;  %v1154_v35 = vcombine.high %v95_v32, %v95_v32 }
  0x54   :  { %1247 = vmatpush3.bf16.msra.mxu0 %v1407_v10  ;;  %v1424_v27 = vld [vmem:[#allocation8 + $0xb0] sm:$0xff]   ;;  %v1428_v31 = vld [vmem:[#allocation8 + $0xb8] sm:$0xff]   ;;  %v1155_v36 = vcombine.low %v96_v33, %v96_v33  ;;  %v1156_v37 = vcombine.high %v96_v33, %v96_v33  ;;  %v1433_v38 = vld [vmem:[#allocation8 + $0x140] sm:$0xff]  }
  0x55   :  { %1269 = vmatpush3.bf16.msra.mxu1 %v1408_v11  ;;  %1248 = vmatprep.subr.bf16.mxu0 %v1409_v12  ;;  %v1434_v39 = vld [vmem:[#allocation8 + $0x1c0] sm:$0xff]   ;;  %v1437_v42 = vld [vmem:[#allocation8 + $0x148] sm:$0xff]   ;;  %v1441_v46 = vld [vmem:[#allocation8 + $0x150] sm:$0xff]   ;;  %v1613_v12 = vmov 0.0  }
  0x56   :  { %1270 = vmatprep.subr.bf16.mxu1 %v1410_v13  ;;  %671 = vmatprep.mubr.bf16.mxu0 %v1154_v35  ;;  %v1435_v40 = vld [vmem:[#allocation8 + $0x100] sm:$0xff]   ;;  %v1438_v43 = vld [vmem:[#allocation8 + $0x1c8] sm:$0xff]   ;;  %v1442_v47 = vld [vmem:[#allocation8 + $0x1d0] sm:$0xff]   ;;  %93 = vst [vmem:[#allocation3] sm:$0x1] %v1613_v12 }
  0x57   :  { %711 = vmatprep.mubr.bf16.mxu1 %v1156_v37  ;;  %v1436_v41 = vld [vmem:[#allocation8 + $0x180] sm:$0xff]   ;;  %v1439_v44 = vld [vmem:[#allocation8 + $0x108] sm:$0xff]   ;;  %v1443_v48 = vld [vmem:[#allocation8 + $0x110] sm:$0xff]   ;;  %94 = vst [vmem:[#allocation4] sm:$0x1] %v1613_v12 }
  0x58   :  { %1249 = vmatpush3.bf16.msra.mxu0 %v1411_v14  ;;  %v1440_v45 = vld [vmem:[#allocation8 + $0x188] sm:$0xff]   ;;  %v1444_v49 = vld [vmem:[#allocation8 + $0x190] sm:$0xff]   ;;  %v1445_v50 = vld [vmem:[#allocation8 + $0x158] sm:$0xff]  }
  0x59   :  { %1271 = vmatpush3.bf16.msra.mxu1 %v1412_v15  ;;  %1250 = vmatprep.subr.bf16.mxu0 %v1413_v16  ;;  %v1446_v51 = vld [vmem:[#allocation8 + $0x1d8] sm:$0xff]   ;;  %v1449_v54 = vld [vmem:[#allocation8 + $0x160] sm:$0xff]   ;;  %v1453_v58 = vld [vmem:[#allocation8 + $0x168] sm:$0xff]  }
  0x5a   :  { %1272 = vmatprep.subr.bf16.mxu1 %v1414_v17  ;;  %v1447_v52 = vld [vmem:[#allocation8 + $0x118] sm:$0xff]   ;;  %v1450_v55 = vld [vmem:[#allocation8 + $0x1e0] sm:$0xff]   ;;  %v1454_v59 = vld [vmem:[#allocation8 + $0x1e8] sm:$0xff]  }
  0x5b   :  { %v1448_v53 = vld [vmem:[#allocation8 + $0x198] sm:$0xff]   ;;  %v1451_v56 = vld [vmem:[#allocation8 + $0x120] sm:$0xff]   ;;  %v1455_v60 = vld [vmem:[#allocation8 + $0x128] sm:$0xff]  }
  0x5c   :  { %1251 = vmatpush3.bf16.msra.mxu0 %v1415_v18  ;;  %v1452_v57 = vld [vmem:[#allocation8 + $0x1a0] sm:$0xff]   ;;  %v1456_v61 = vld [vmem:[#allocation8 + $0x1a8] sm:$0xff]   ;;  %v1457_v62 = vld [vmem:[#allocation8 + $0x170] sm:$0xff]  }
  0x5d   :  { %1273 = vmatpush3.bf16.msra.mxu1 %v1416_v19  ;;  %1252 = vmatprep.subr.bf16.mxu0 %v1417_v20  ;;  %v1458_v63 = vld [vmem:[#allocation8 + $0x1f0] sm:$0xff]   ;;  %v1461_v2 = vld [vmem:[#allocation8 + $0x178] sm:$0xff]   ;;  %v1469_v13 = vld [vmem:[#allocation10] sm:$0xff]  }
  0x5e   :  { %1274 = vmatprep.subr.bf16.mxu1 %v1418_v21  ;;  %v1459_v0 = vld [vmem:[#allocation8 + $0x130] sm:$0xff]   ;;  %v1462_v3 = vld [vmem:[#allocation8 + $0x1f8] sm:$0xff]   ;;  %v1470_v14 = vld [vmem:[#allocation10 + $0x8] sm:$0xff]  }
  0x5f   :  { %v1460_v1 = vld [vmem:[#allocation8 + $0x1b0] sm:$0xff]   ;;  %v1463_v4 = vld [vmem:[#allocation8 + $0x138] sm:$0xff]   ;;  %v1473_v17 = vld [vmem:[#allocation10 + $0x20] sm:$0xff]  }
  0x60   :  { %1253 = vmatpush3.bf16.msra.mxu0 %v1419_v22  ;;  %v1464_v5 = vld [vmem:[#allocation8 + $0x1b8] sm:$0xff]   ;;  %v97_v6 = vld [vmem:[#allocation5 + $0x10] sm:$0xff]  ;;  %v1474_v18 = vld [vmem:[#allocation10 + $0x28] sm:$0xff]  }
  0x61   :  { %1275 = vmatpush3.bf16.msra.mxu1 %v1420_v23  ;;  %1254 = vmatprep.subr.bf16.mxu0 %v1421_v24  ;;  %v1157_v7 = vcombine.low %v97_v6, %v97_v6  ;;  %v1158_v8 = vcombine.high %v97_v6, %v97_v6  ;;  %v98_v9 = vld [vmem:[#allocation5 + $0x18] sm:$0xff]  ;;  %v1471_v15 = vld [vmem:[#allocation10 + $0x10] sm:$0xff]  }
  0x62   :  { %1276 = vmatprep.subr.bf16.mxu1 %v1422_v25  ;;  %v1159_v10 = vcombine.low %v98_v9, %v98_v9  ;;  %v1160_v11 = vcombine.high %v98_v9, %v98_v9  ;;  %v1472_v16 = vld [vmem:[#allocation10 + $0x18] sm:$0xff]   ;;  %v1475_v19 = vld [vmem:[#allocation10 + $0x30] sm:$0xff]  }
  0x63   :  { %v1476_v20 = vld [vmem:[#allocation10 + $0x38] sm:$0xff]  }
  0x64   :  { %1255 = vmatpush3.bf16.msra.mxu0 %v1423_v26 }
  0x65   :  { %1277 = vmatpush3.bf16.msra.mxu1 %v1424_v27  ;;  %1256 = vmatprep.subr.bf16.mxu0 %v1425_v28 }
  0x66   :  { %1278 = vmatprep.subr.bf16.mxu1 %v1426_v29 }
  0x68   :  { %1257 = vmatpush3.bf16.msra.mxu0 %v1427_v30 }
  0x69   :  { %1279 = vmatpush3.bf16.msra.mxu1 %v1428_v31  ;;  %1286 = vmatprep.subr.bf16.mxu0 %v1433_v38 }
  0x6a   :  { %1308 = vmatprep.subr.bf16.mxu1 %v1434_v39 }
  0x6b   :  { %672 = vmatmul.mubr.bf16.vlgmr.msra.gmra.mrb[0].mxu0 %v1153_v34 }
  0x6c   :  { %712 = vmatmul.mubr.bf16.vlgmr.msra.gmra.mrb[0].mxu1 %v1155_v36  ;;  %1287 = vmatpush3.bf16.msra.mxu0 %v1435_v40 }
  0x6d   :  { %1309 = vmatpush3.bf16.msra.mxu1 %v1436_v41  ;;  %1288 = vmatprep.subr.bf16.mxu0 %v1437_v42 }
  0x6e   :  { %1310 = vmatprep.subr.bf16.mxu1 %v1438_v43  ;;  %751 = vmatprep.mubr.bf16.mxu0 %v1158_v8 }
  0x6f   :  { %791 = vmatprep.mubr.bf16.mxu1 %v1160_v11  ;;  %v843_v11 = vld [vmem:[%s1779_s3] sm:$0x1] }
  0x70   :  { %1289 = vmatpush3.bf16.msra.mxu0 %v1439_v44 }
  0x71   :  { %1311 = vmatpush3.bf16.msra.mxu1 %v1440_v45  ;;  %1290 = vmatprep.subr.bf16.mxu0 %v1441_v46 }
  0x72   :  { %1312 = vmatprep.subr.bf16.mxu1 %v1442_v47 }
  0x74   :  { %1291 = vmatpush3.bf16.msra.mxu0 %v1443_v48 }
  0x75   :  { %1313 = vmatpush3.bf16.msra.mxu1 %v1444_v49  ;;  %1292 = vmatprep.subr.bf16.mxu0 %v1445_v50 }
  0x76   :  { %1314 = vmatprep.subr.bf16.mxu1 %v1446_v51 }
  0x78   :  { %1293 = vmatpush3.bf16.msra.mxu0 %v1447_v52 }
  0x79   :  { %1315 = vmatpush3.bf16.msra.mxu1 %v1448_v53  ;;  %1294 = vmatprep.subr.bf16.mxu0 %v1449_v54  ;;  %v818_v54 = vld [vmem:[#allocation3] sm:$0x1] }
  0x7a   :  { %1316 = vmatprep.subr.bf16.mxu1 %v1450_v55 }
  0x7c   :  { %1295 = vmatpush3.bf16.msra.mxu0 %v1451_v56 }
  0x7d   :  { %1317 = vmatpush3.bf16.msra.mxu1 %v1452_v57  ;;  %1296 = vmatprep.subr.bf16.mxu0 %v1453_v58  ;;  %v827_v57 = vld [vmem:[#allocation4] sm:$0x1] }
  0x7e   :  { %1318 = vmatprep.subr.bf16.mxu1 %v1454_v59 }
  0x80   :  { %1297 = vmatpush3.bf16.msra.mxu0 %v1455_v60 }
  0x81   :  { %1319 = vmatpush3.bf16.msra.mxu1 %v1456_v61  ;;  %1298 = vmatprep.subr.bf16.mxu0 %v1457_v62 }
  0x82   :  { %1320 = vmatprep.subr.bf16.mxu1 %v1458_v63 }
  0x84   :  { %1299 = vmatpush3.bf16.msra.mxu0 %v1459_v0 }
  0x85   :  { %1321 = vmatpush3.bf16.msra.mxu1 %v1460_v1  ;;  %1300 = vmatprep.subr.bf16.mxu0 %v1461_v2 }
  0x86   :  { %1322 = vmatprep.subr.bf16.mxu1 %v1462_v3 }
  0x88   :  { %1301 = vmatpush3.bf16.msra.mxu0 %v1463_v4 }
  0x89   :  { %1323 = vmatpush3.bf16.msra.mxu1 %v1464_v5  ;;  %1348 = vmatprep.subr.bf16.mxu0 %v1613_v12  ;;  %v839_v5 = vlaneseq }
  0x8a   :  { %1368 = vmatprep.subr.bf16.mxu1 %v1613_v12 }
  0x8b   :  { %752 = vmatmul.mubr.bf16.vlgmr.msra.gmra.mrb[4].mxu0 %v1157_v7  ;;  %v840_v6 = vshrl.u32 %v839_v5, 7  ;;  %v842_v7 = vld [vmem:[%s1778_s2] sm:$0x1] }
  0x8c   :  { %792 = vmatmul.mubr.bf16.vlgmr.msra.gmra.mrb[4].mxu1 %v1159_v10  ;;  %1349 = vmatpush3.bf16.msra.mxu0 %v1469_v13 }
  0x8d   :  { %1350 = vmatprep.subr.bf16.mxu0 %v1613_v12  ;;  %1364 = vmatprep.mubr.msk.bf16.mxu0 %vm1614_vm0, %v1613_v12  ;;  %v1739_v8 = vsub.s32 0, %v840_v6  ;;  %vm841_vm2 = vcmp.lt.s32.totalorder %v840_v6, 2 }
  0x8e   :  { %1384 = vmatprep.mubr.msk.bf16.mxu1 %vm1614_vm0, %v1613_v12 }
  0x90   :  { %1351 = vmatpush3.bf16.msra.mxu0 %v1470_v14 }
  0x91   :  { %1352 = vmatprep.subr.bf16.mxu0 %v1613_v12 }
  0x94   :  { %1353 = vmatpush3.bf16.msra.mxu0 %v1471_v15 }
  0x95   :  { %1354 = vmatprep.subr.bf16.mxu0 %v1613_v12 }
  0x98   :  { %1355 = vmatpush3.bf16.msra.mxu0 %v1472_v16 }
  0x99   :  { %1356 = vmatprep.subr.bf16.mxu0 %v1613_v12 }
  0x9c   :  { %1357 = vmatpush3.bf16.msra.mxu0 %v1473_v17 }
  0x9d   :  { %1358 = vmatprep.subr.bf16.mxu0 %v1613_v12 }
  0xa0   :  { %1359 = vmatpush3.bf16.msra.mxu0 %v1474_v18 }
  0xa1   :  { %1360 = vmatprep.subr.bf16.mxu0 %v1613_v12 }
  0xa4   :  { %1361 = vmatpush3.bf16.msra.mxu0 %v1475_v19 }
  0xa5   :  { %1362 = vmatprep.subr.bf16.mxu0 %v1613_v12 }
  0xa8   :  { %1363 = vmatpush3.bf16.msra.mxu0 %v1476_v20 }
 0x13e   :  { %v1258_v21 = vpop.f32.mrb[0].mxu0 }
 0x13f   :  { %v1280_v22 = vpop.f32.mrb[0].mxu1  ;;  %v1259_v23 = vpop.f32.mrb[1].mxu0 }
 0x140   :  { %v1281_v24 = vpop.f32.mrb[1].mxu1  ;;  %v1260_v25 = vadd.f32 %v1259_v23, %v1258_v21  ;;  %v1261_v27 = vpop.f32.mrb[2].mxu0  ;;  %v1478_v23 = vld [vmem:[#allocation11 + $0x8] sm:$0xff]  }
 0x141   :  { %v1282_v26 = vadd.f32 %v1281_v24, %v1280_v22  ;;  %v1283_v28 = vpop.f32.mrb[2].mxu1  ;;  %v1262_v29 = vpop.f32.mrb[3].mxu0  ;;  %v1477_v22 = vld [vmem:[#allocation11] sm:$0xff]   ;;  %v1479_v24 = vld [vmem:[#allocation11 + $0x10] sm:$0xff]   ;;  %v1482_v27 = vld [vmem:[#allocation11 + $0x28] sm:$0xff]  }
 0x142   :  { %v1284_v30 = vpop.f32.mrb[3].mxu1  ;;  %1369 = vmatpush3.bf16.msra.mxu1 %v1477_v22  ;;  %v1483_v28 = vld [vmem:[#allocation11 + $0x30] sm:$0xff]   ;;  %v1484_v29 = vld [vmem:[#allocation11 + $0x38] sm:$0xff]  }
 0x143   :  { %v714_v31 = vadd.f32 %v1282_v26, %v1260_v25  ;;  %1370 = vmatprep.subr.bf16.mxu1 %v1613_v12  ;;  %v1480_v25 = vld [vmem:[#allocation11 + $0x18] sm:$0xff]   ;;  %v1481_v26 = vld [vmem:[#allocation11 + $0x20] sm:$0xff]  }
 0x146   :  { %1371 = vmatpush3.bf16.msra.mxu1 %v1478_v23 }
 0x147   :  { %1372 = vmatprep.subr.bf16.mxu1 %v1613_v12 }
 0x14a   :  { %1373 = vmatpush3.bf16.msra.mxu1 %v1479_v24 }
 0x14b   :  { %1374 = vmatprep.subr.bf16.mxu1 %v1613_v12 }
 0x14e   :  { %1375 = vmatpush3.bf16.msra.mxu1 %v1480_v25 }
 0x14f   :  { %1376 = vmatprep.subr.bf16.mxu1 %v1613_v12 }
 0x152   :  { %1377 = vmatpush3.bf16.msra.mxu1 %v1481_v26 }
 0x153   :  { %1378 = vmatprep.subr.bf16.mxu1 %v1613_v12 }
 0x156   :  { %1379 = vmatpush3.bf16.msra.mxu1 %v1482_v27 }
 0x157   :  { %1380 = vmatprep.subr.bf16.mxu1 %v1613_v12 }
 0x15a   :  { %1381 = vmatpush3.bf16.msra.mxu1 %v1483_v28 }
 0x15b   :  { %1382 = vmatprep.subr.bf16.mxu1 %v1613_v12 }
 0x15e   :  { %v1302_v32 = vpop.f32.mrb[4].mxu0  ;;  %1383 = vmatpush3.bf16.msra.mxu1 %v1484_v29 }
 0x15f   :  { %v1324_v33 = vpop.f32.mrb[4].mxu1  ;;  %v1303_v34 = vpop.f32.mrb[5].mxu0 }
 0x160   :  { %v1325_v35 = vpop.f32.mrb[5].mxu1  ;;  %v1304_v36 = vadd.f32 %v1303_v34, %v1302_v32  ;;  %v1305_v38 = vpop.f32.mrb[6].mxu0 }
 0x161   :  { %v1326_v37 = vadd.f32 %v1325_v35, %v1324_v33  ;;  %v1327_v39 = vpop.f32.mrb[6].mxu1  ;;  %v1306_v40 = vpop.f32.mrb[7].mxu0 }
 0x162   :  { %v1328_v41 = vpop.f32.mrb[7].mxu1  ;;  %v754_v42 = vadd.f32 %v1304_v36, %v714_v31 }
 0x164   :  { %v794_v43 = vadd.f32 %v1326_v37, %v754_v42 }
 0x166   :  { %v819_v44 = vrot.slane %v794_v43, 4  ;;  %v828_v45 = vmul.f32 %v794_v43, %v794_v43 }
 0x168   :  { %v820_v46 = vadd.f32 %v819_v44, %v794_v43  ;;  %v829_v47 = vrot.slane %v828_v45, 4 }
 0x16a   :  { %v821_v48 = vrot.slane %v820_v46, 2  ;;  %v830_v49 = vadd.f32 %v829_v47, %v828_v45 }
 0x16c   :  { %v822_v50 = vadd.f32 %v821_v48, %v820_v46  ;;  %v831_v51 = vrot.slane %v830_v49, 2 }
 0x16e   :  { %v823_v52 = vrot.slane %v822_v50, 1  ;;  %v832_v53 = vadd.f32 %v831_v51, %v830_v49 }
 0x170   :  { %v824_v55 = vadd.f32 %v823_v52, %v822_v50  ;;  %v833_v56 = vrot.slane %v832_v53, 1  ;;  %v890_v52 = vld [vmem:[%s1781_s5] sm:$0x1] }
 0x172   :  { %v825_v58 = vadd.f32 %v824_v55, %v818_v54  ;;  %v834_v59 = vadd.f32 %v833_v56, %v832_v53  ;;  %v891_v55 = vld [vmem:[%s1782_s6] sm:$0x1]  ;;  %s1577_s6 = scalar_lea.vmem %s1143_s22, 128 }
 0x173   :  { %p1578_p4 = scmp.ne.s32.totalorder %s1143_s22, %s1577_s6  ;;  %p1583_p6 = scmp.lt.s32.totalorder %s1577_s6, %s1577_s6 }
 0x174   :  { %826 = vst [vmem:[#allocation3] sm:$0x1] %v825_v58  ;;  %v835_v60 = vadd.f32 %v834_v59, %v827_v57 }
 0x175   :  { %p1584_p7 = por %p1583_p6, %p1582_p5 }
 0x176   :  { %836 = vst [vmem:[#allocation4] sm:$0x1] %v835_v60 }
 0x177   :  { %p1585_p8 = pnand %p1584_p7, %p1578_p4 }
 0x17b   :  { %v844_v61 = vld [vmem:[#allocation3] sm:$0x1] }
 0x17c   :  { %v845_v62 = vmul.f32 0.5, %v844_v61 }
 0x17d   :  { %v846_v63 = vld [vmem:[#allocation4] sm:$0x1] }
 0x17e   :  { %v847_v0 = vmul.f32 0.5, %v846_v63  ;;  %v848_v1 = vmul.f32 %v845_v62, %v845_v62 }
 0x180   :  { %v849_v2 = vsub.f32 %v847_v0, %v848_v1  ;;  %v1233_v1 = vld [vmem:[%s1784_s8] ss:$0 sm:$0xff] }
 0x182   :  { %v850_v3 = vmax.f32 %v849_v2, 0.0 }
 0x184   :  { %v851_v4 = vadd.f32 1e-05, %v850_v3 }
 0x186   :  { %1485 = vrsqrt.f32 %v851_v4 }
 0x190   :  { %v1486_v9 = vpop.eup %1485 }
 0x191   :  { %v853_v10 = vmul.f32 %v1486_v9, %v842_v7 }
 0x193   :  { %v854_v13 = vmul.f32 %v853_v10, %v845_v62  ;;  %v861_v14 = vrot.slane %v853_v10, %v1739_v8 }
 0x195   :  { %v855_v15 = vsub.f32 %v843_v11, %v854_v13  ;;  %v863_v16 = vmul.f32 %v861_v14, %v794_v43 }
 0x197   :  { %v868_v17 = vrot.slane %v855_v15, %v1739_v8 }
 0x199   :  { %v870_v18 = vadd.f32 %v868_v17, %v863_v16 }
 0x19b   :  { %vm871_vm1 = vcmp.ge.f32.partialorder %v870_v18, 0.0  ;;  %v872_v19 = vmul.f32 0.01, %v870_v18 }
 0x19d   :  { %v873_v20 = vsel %vm871_vm1, %v870_v18, %v872_v19 }
 0x19e   :  { %v892_v21 = vpack.c.bf16 %v873_v20, %v873_v20 }
 0x1a0   :  { %1365 = vmatmul.mubr.bf16.vlgmr.msra.gmra.mrb[8].mxu0 %v892_v21 }
 0x273   :  { %v975_v30 = vpop.f32.mrb[8].mxu0 }
 0x274   :  { %v983_v31 = vsel %vm841_vm2, %v975_v30, 0.0  ;;  %v1366_v32 = vpop.f32.mrb[9].mxu0 }
 0x275   :  { %v984_v33 = vrot.slane %v983_v31, 4  ;;  %v978_v34 = vpop.f32.mrb[10].mxu0 }
 0x276   :  { %v1367_v35 = vpop.f32.mrb[11].mxu0 }
 0x277   :  { %v985_v36 = vadd.f32 %v984_v33, %v983_v31 }
 0x279   :  { %v986_v37 = vrot.slane %v985_v36, 2 }
 0x27b   :  { %v987_v38 = vadd.f32 %v986_v37, %v985_v36 }
 0x27d   :  { %v988_v39 = vrot.slane %v987_v38, 1 }
 0x27f   :  { %v989_v40 = vadd.f32 %v988_v39, %v987_v38 }
 0x281   :  { %v990_v41 = vmul.f32 0.5, %v989_v40 }
 0x283   :  { %v991_v42 = vsub.f32 %v975_v30, %v990_v41 }
 0x285   :  { %v992_v43 = vsel %vm841_vm2, %v991_v42, 0.0 }
 0x286   :  { %v993_v44 = vmul.f32 %v992_v43, %v992_v43 }
 0x288   :  { %v994_v45 = vrot.slane %v993_v44, 4 }
 0x28a   :  { %v995_v12 = vadd.f32 %v994_v45, %v993_v44 }
 0x28c   :  { %v996_v46 = vrot.slane %v995_v12, 2 }
 0x28e   :  { %v997_v47 = vadd.f32 %v996_v46, %v995_v12 }
 0x290   :  { %v998_v48 = vrot.slane %v997_v47, 1 }
 0x292   :  { %v999_v49 = vadd.f32 %v998_v48, %v997_v47 }
 0x294   :  { %v1000_v50 = vmul.f32 0.5, %v999_v49 }
 0x296   :  { %v1001_v51 = vadd.f32 1e-05, %v1000_v50 }
 0x298   :  { %1487 = vrsqrt.f32 %v1001_v51 }
 0x2a2   :  { %v1488_v53 = vpop.eup %1487 }
 0x2a3   :  { %v1003_v54 = vmul.f32 %v1488_v53, %v890_v52 }
 0x2a5   :  { %v1004_v56 = vmul.f32 %v1003_v54, %v990_v41  ;;  %v1010_v57 = vrot.slane %v1003_v54, %v1739_v8 }
 0x2a7   :  { %v1005_v58 = vsub.f32 %v891_v55, %v1004_v56  ;;  %v1012_v59 = vmul.f32 %v1010_v57, %v975_v30 }
 0x2a9   :  { %v1017_v60 = vrot.slane %v1005_v58, %v1739_v8 }
 0x2ab   :  { %v1019_v61 = vadd.f32 %v1017_v60, %v1012_v59 }
 0x2ad   :  { %v1021_v62 = vmul.f32 0.01, %v1019_v61  ;;  %vm1020_vm3 = vcmp.ge.f32.partialorder %v1019_v61, 0.0 }
 0x2af   :  { %v1022_v63 = vsel %vm1020_vm3, %v1019_v61, %v1021_v62 }
 0x2b0   :  { %v1040_v0 = vpack.c.bf16 %v1022_v63, %v1022_v63 }
 0x2b2   :  { %1385 = vmatmul.mubr.bf16.vlgmr.msra.gmra.mrb[8].mxu1 %v1040_v0 }
 0x385   :  { %v1129_v2 = vpop.f32.mrb[8].mxu1 }
 0x386   :  { %v1130_v3 = vadd.f32 %v1233_v1, %v1129_v2  ;;  %v1386_v4 = vpop.f32.mrb[9].mxu1 }
 0x387   :  { %v1132_v5 = vpop.f32.mrb[10].mxu1 }
 0x388   :  { %1135 = vst [vmem:[#allocation13] sm:$0xff] %v1130_v3  ;;  %v1387_v6 = vpop.f32.mrb[11].mxu1 }
 0x389   :  { %1588 = shalt.err (!%p1585_p8)
}
 0x38a   :  { %s1589_s8 = scalar_lea.hbm %s1785_s9, 128 }
 0x38b   :  { %p1590_p9 = scmp.ne.s32.totalorder %s1785_s9, %s1589_s8  ;;  %p1593_p10 = scmp.lt.u32.totalorder %s1589_s8, %s1785_s9 }
 0x38d   :  { %p1595_p11 = pnand %p1593_p10, %p1590_p9 }
 0x38f   :  { %1598 = shalt.err (!%p1595_p11)
}
 0x390   :  { %1145 = dma.vmem_to_hbm [thread:$0]  %s1143_s22, 128, %s1785_s9, [#allocation7]  }
 0x391   :  { %1605 = dma.done.wait [#allocation7], 128  }
 0x392   :  { %1606 = vsyncadd [#allocation7], 4294967168 }
 0x393   :  { %1149 = vsyncpa [#allocation6], 1 }
 0x394   :  { %1150 = vsyncpa [#allocation9], 1 }
 0x395   :  { %1151 = vsyncpa [#allocation12], 1 }
 0x396   :  { %1152 = vsyncpa [#allocation7], 1 }

</bundles_post_ra>
